<compile_context>
chip_gen: v7x
topology: tpu7x:2x2x1
jax: 0.10.0
libtpu: 0.0.40
codegen_flags: <defaults>
</compile_context>

<pallas_src>
import jax
import jax.numpy as jnp
from jax import lax
from jax.experimental import pallas as pl
from jax.experimental.pallas import tpu as pltpu

IN_SIZE = 512               # Encoder_Feature_Linear in_size (hardcoded in the module)
OUT_SIZE = 4                # out_size
HID = OUT_SIZE * 4          # 16, hidden width of the per-plane MLP
D1, D2, D3 = 512, 256, 6    # OCD head dims[1:]

# Row layout of the packed per-plane aux slab (P_pad, 8, HID):
#   rows 0..3      -> linear2.weight (4, 16)
#   row  4         -> linear1.bias   (16,)
#   row  5[:4]     -> linear2.bias   (4,)
#   rows 6..7      -> zero padding
_AUX_FW2_ROWS = (0, OUT_SIZE)
_AUX_FB1_ROW = OUT_SIZE
_AUX_FB2_ROW = OUT_SIZE + 1


# ------------------------------- Fused kernel -------------------------------
def _encoder_ocd_kernel(x_ref, w1_ref, aux_ref, ow1_ref,
                        ob1_ref, ow2_ref, ob2_ref, ow3_ref,
                        o_ref, acc_ref):
    g = pl.program_id(0)

    @pl.when(g == 0)
    def _init():
        acc_ref[...] = jnp.zeros_like(acc_ref)

    # Unpack the per-plane aux slab (one contiguous DMA per step).
    aux = aux_ref[...]                                           # (pp, 8, 16)
    fw2 = aux[:, _AUX_FW2_ROWS[0]:_AUX_FW2_ROWS[1], :]           # (pp, 4, 16)
    fb1 = aux[:, _AUX_FB1_ROW:_AUX_FB1_ROW + 1, :]               # (pp, 1, 16)
    fb2 = aux[:, _AUX_FB2_ROW:_AUX_FB2_ROW + 1, 0:OUT_SIZE]      # (pp, 1, 4)

    # ---- Stage 1: per-plane linear1 + ReLU (batched over the pp planes) ----
    # x_ref: (pp, B, 512), w1_ref: (pp, 16, 512)  ->  h: (pp, B, 16)
    # NOTE: M = B is tiny, so MXU utilisation is low here; with f32 weights the
    # fw1 DMA stream still dominates (memory-bound), so this is off-crit-path.
    h = lax.dot_general(x_ref[...], w1_ref[...],
                        (((2,), (2,)), ((0,), (0,))),
                        preferred_element_type=jnp.float32)
    h = jnp.maximum(h + fb1, 0.0)

    # ---- Stage 2: per-plane linear2 + ReLU ----
    # h: (pp, B, 16), fw2: (pp, 4, 16)  ->  f: (pp, B, 4)
    f = lax.dot_general(h, fw2,
                        (((2,), (2,)), ((0,), (0,))),
                        preferred_element_type=jnp.float32)
    f = jnp.maximum(f + fb2, 0.0)

    # ---- OCD head layer 1, plane reduction fused into the matmul ----
    # acc[b, d] += sum_{p in block, o} f[p, b, o] * ow1[o, p, d]
    # One K=pp MXU matmul per feature channel o (4 total): no (pp, B, 512)
    # intermediate, no serial axis-0 VPU reduction.
    contrib = lax.dot_general(f[:, :, 0], ow1_ref[0],
                              (((0,), (0,)), ((), ())),
                              preferred_element_type=jnp.float32)    # (B, 512)
    for o in range(1, OUT_SIZE):
        contrib = contrib + lax.dot_general(f[:, :, o], ow1_ref[o],
                                            (((0,), (0,)), ((), ())),
                                            preferred_element_type=jnp.float32)
    acc_ref[...] += contrib

    # ---- Finish the head on the last plane block ----
    @pl.when(g == pl.num_programs(0) - 1)
    def _finish():
        h1 = jnp.maximum(acc_ref[...] + ob1_ref[...], 0.0)           # (B, 512)
        h2 = jnp.dot(h1, ow2_ref[...],
                     preferred_element_type=jnp.float32) + ob2_ref[...]
        h2 = jnp.maximum(h2, 0.0)                                    # (B, 256)
        h3 = jnp.dot(h2, ow3_ref[...],
                     preferred_element_type=jnp.float32)             # (B, 6)
        o_ref[...] = jnp.clip(h3, 0.0, 6.0).astype(o_ref.dtype)      # ReLU6


# --------------------------------- Tiling ------------------------------------
def choose_pp(P, B, budget_bytes=12 << 20, max_pp=128):
    """Planes per grid step.

    Must be a multiple of 8 so the (4, pp, 512) ow1 block is sublane-aligned.
    Picks the candidate that (a) keeps the double-buffered per-step VMEM under
    `budget_bytes`, then (b) minimises grid steps, then (c) minimises plane
    padding.  For inplanes=196 / small B this yields 2-3 grid steps.
    """
    b_pad = max(8, B)  # sublane padding of the x block
    per_plane = 2 * 4 * (HID * IN_SIZE          # fw1 block (double-buffered, f32)
                         + b_pad * IN_SIZE      # x block
                         + OUT_SIZE * D1        # ow1 block
                         + 8 * 128)             # aux block (lane-padded)
    cap = int(budget_bytes // per_plane)
    cap = max(8, min(max_pp, (cap // 8) * 8))
    best_pp, best_key = None, None
    for pp in range(8, cap + 8, 8):
        steps = -(-P // pp)
        key = (steps, steps * pp - P, -pp)
        if best_key is None or key < best_key:
            best_pp, best_key = pp, key
    return best_pp


# --------------------------- One-time weight packing --------------------------
def pack_params(params, pp):
    """Pad + re-layout the weights for the kernel. Call ONCE at init, not per step."""
    P = params["fw1"].shape[0]
    n_blocks = -(-P // pp)
    P_pad = n_blocks * pp
    pad = P_pad - P
    f32 = jnp.float32

    fw1 = jnp.pad(params["fw1"].astype(f32), ((0, pad), (0, 0), (0, 0)))  # (P_pad,16,512)

    # Packed per-plane aux slab: linear2.weight | linear1.bias | linear2.bias.
    aux = jnp.zeros((P_pad, 8, HID), f32)
    aux = aux.at[:P, _AUX_FW2_ROWS[0]:_AUX_FW2_ROWS[1], :].set(params["fw2"].astype(f32))
    aux = aux.at[:P, _AUX_FB1_ROW, :].set(params["fb1"].astype(f32))
    aux = aux.at[:P, _AUX_FB2_ROW, :OUT_SIZE].set(params["fb2"].astype(f32))

    # ocd_linear1.weight.T (P*4, 512), rows plane-major -> channel-major (4, P_pad, 512):
    # each ow1[o] is a dense (P_pad, 512) slab feeding the fused K=pp matmul.
    ow1 = params["ow1"].astype(f32).reshape(P, OUT_SIZE, D1).transpose(1, 0, 2)
    ow1 = jnp.pad(ow1, ((0, 0), (0, pad), (0, 0)))

    return dict(
        fw1=fw1, aux=aux, ow1=ow1,
        ob1=params["ob1"].astype(f32)[None, :],
        ow2=params["ow2"].astype(f32),
        ob2=params["ob2"].astype(f32)[None, :],
        ow3=params["ow3"].astype(f32),
    )


# ----------------------------------- Forward ----------------------------------
def encoder_ocd_forward(x, packed, *, pp):
    """x: (B, 512, P) float32  ->  (B, 6) float32."""
    B, IN, P = x.shape
    assert IN == IN_SIZE
    P_pad = packed["fw1"].shape[0]
    n_blocks = P_pad // pp
    assert n_blocks * pp == P_pad and P_pad >= P
    assert pp % 8 == 0 or n_blocks == 1, "pp must be a multiple of 8 (or a single block)"

    # Per-call glue: plane-major input layout (zero-padded planes give exactly
    # zero features / zero head contribution).
    # TODO(synk): have the upstream producer emit x as (P_pad, B, 512) so this
    # transpose+pad disappears from the per-call path.
    x_t = jnp.transpose(x, (2, 0, 1))
    if P_pad > P:
        x_t = jnp.pad(x_t, ((0, P_pad - P), (0, 0), (0, 0)))

    return pl.pallas_call(
        _encoder_ocd_kernel,
        out_shape=jax.ShapeDtypeStruct((B, D3), x.dtype),
        grid_spec=pltpu.PrefetchScalarGridSpec(
            num_scalar_prefetch=0,
            grid=(n_blocks,),
            in_specs=[
                pl.BlockSpec((pp, B, IN_SIZE), lambda g: (g, 0, 0)),        # x
                pl.BlockSpec((pp, HID, IN_SIZE), lambda g: (g, 0, 0)),      # fw1
                pl.BlockSpec((pp, 8, HID), lambda g: (g, 0, 0)),            # aux (fw2|fb1|fb2)
                pl.BlockSpec((OUT_SIZE, pp, D1), lambda g: (0, g, 0)),      # ow1 (channel-major)
                pl.BlockSpec((1, D1), lambda g: (0, 0)),                    # ob1  (resident)
                pl.BlockSpec((D1, D2), lambda g: (0, 0)),                   # ow2  (resident)
                pl.BlockSpec((1, D2), lambda g: (0, 0)),                    # ob2  (resident)
                pl.BlockSpec((D2, D3), lambda g: (0, 0)),                   # ow3  (resident)
            ],
            out_specs=pl.BlockSpec((B, D3), lambda g: (0, 0)),
            scratch_shapes=[pltpu.VMEM((B, D1), jnp.float32)],
        ),
        compiler_params=pltpu.CompilerParams(
            # The plane-block axis is a reduction axis (head-1 accumulator).
            # TODO(synk): on v7x, split this reduction across the 2 TensorCores
            # (per-core partial accumulators) to use both HBM paths.
            dimension_semantics=("arbitrary",),
            # Explicit limit so large plane blocks are safe on v5e's 16 MiB
            # default scoped VMEM (and well under v7x's 64 MiB physical).
            vmem_limit_bytes=32 * 1024 * 1024,
        ),
    )(x_t, packed["fw1"], packed["aux"], packed["ow1"],
      packed["ob1"], packed["ow2"], packed["ob2"], packed["ow3"])


# --------------------------- Deterministic params ----------------------------
def init_params(key, P):
    """Torch-equivalent parameter layouts (see module docstring)."""
    ks = jax.random.split(key, 9)
    s = 0.05
    f32 = jnp.float32
    return dict(
        fw1=jax.random.normal(ks[0], (P, HID, IN_SIZE), f32) * s,    # linear1.weight
        fb1=jax.random.normal(ks[1], (P, HID), f32) * s,             # linear1.bias
        fw2=jax.random.normal(ks[2], (P, OUT_SIZE, HID), f32) * s,   # linear2.weight
        fb2=jax.random.normal(ks[3], (P, OUT_SIZE), f32) * s,        # linear2.bias
        ow1=jax.random.normal(ks[4], (P * OUT_SIZE, D1), f32) * s,   # ocd_linear1.weight.T
        ob1=jax.random.normal(ks[5], (D1,), f32) * s,
        ow2=jax.random.normal(ks[6], (D1, D2), f32) * s,             # ocd_linear2.weight.T
        ob2=jax.random.normal(ks[7], (D2,), f32) * s,
        ow3=jax.random.normal(ks[8], (D2, D3), f32) * s,             # ocd_linear3.weight.T
    )


# -------------------------------- Pure-JAX ref --------------------------------
def reference(x, p):
    B, _, P = x.shape
    feats = []
    for i in range(P):
        xi = x[:, :, i]                                               # (B, 512)
        h = jnp.maximum(xi @ p["fw1"][i].T + p["fb1"][i], 0.0)
        f = jnp.maximum(h @ p["fw2"][i].T + p["fb2"][i], 0.0)
        feats.append(f)
    flat = jnp.stack(feats, axis=1).reshape(B, P * OUT_SIZE)          # plane-major flatten
    h = jnp.maximum(flat @ p["ow1"] + p["ob1"], 0.0)
    h = jnp.maximum(h @ p["ow2"] + p["ob2"], 0.0)
    return jnp.clip(h @ p["ow3"], 0.0, 6.0)


if __name__ == "__main__":
    key = jax.random.PRNGKey(0)
    kx1, kp1, kx2, kp2 = jax.random.split(key, 4)

    # Case 1: multi-step reduction grid with plane padding
    # (P=22 -> padded to 24 planes, pp=8 -> 3 grid steps).
    B, P = 2, 22
    x = jax.random.normal(kx1, (B, IN_SIZE, P), jnp.float32)
    params = init_params(kp1, P)
    pp1 = 8
    packed1 = pack_params(params, pp1)                 # one-time re-layout, outside forward
    fwd1 = jax.jit(lambda a, b: encoder_ocd_forward(a, b, pp=pp1))
    out = jax.block_until_ready(fwd1(x, packed1))
    ref = reference(x, params)
    assert out.shape == (B, D3), out.shape
    diff = float(jnp.max(jnp.abs(out - ref)))
    assert jnp.allclose(out, ref, rtol=1e-4, atol=1e-4), f"max abs diff {diff}"

    # Case 2: auto plane-block size, single grid step (P=8).
    B2, P2 = 2, 8
    x2 = jax.random.normal(kx2, (B2, IN_SIZE, P2), jnp.float32)
    params2 = init_params(kp2, P2)
    pp2 = choose_pp(P2, B2)
    packed2 = pack_params(params2, pp2)
    fwd2 = jax.jit(lambda a, b: encoder_ocd_forward(a, b, pp=pp2))
    out2 = jax.block_until_ready(fwd2(x2, packed2))
    ref2 = reference(x2, params2)
    diff2 = float(jnp.max(jnp.abs(out2 - ref2)))
    assert jnp.allclose(out2, ref2, rtol=1e-4, atol=1e-4), f"max abs diff {diff2}"

    print("KERNEL_OK")
</pallas_src>

<mosaic_0001>
module attributes {stable_mosaic.version = 11 : i64} {
  func.func @_encoder_ocd_kernel(%arg0: i32, %arg1: memref<8x2x512xf32, #tpu.memory_space<vmem>>, %arg2: memref<8x16x512xf32, #tpu.memory_space<vmem>>, %arg3: memref<8x8x16xf32, #tpu.memory_space<vmem>>, %arg4: memref<4x8x512xf32, #tpu.memory_space<vmem>>, %arg5: memref<1x512xf32, #tpu.memory_space<vmem>>, %arg6: memref<512x256xf32, #tpu.memory_space<vmem>>, %arg7: memref<1x256xf32, #tpu.memory_space<vmem>>, %arg8: memref<256x6xf32, #tpu.memory_space<vmem>>, %arg9: memref<2x6xf32, #tpu.memory_space<vmem>>, %arg10: memref<2x512xf32, #tpu.memory_space<vmem>>) attributes {dimension_semantics = [#tpu.dimension_semantics<arbitrary>], iteration_bounds = array<i64: 3>, scalar_prefetch = 0 : i64, scratch_operands = 1 : i64, tpu.core_type = #tpu.core_type<tc>, window_params = [{transform_indices = @transform_0, window_bounds = array<i64: 8, 2, 512>}, {transform_indices = @transform_1, window_bounds = array<i64: 8, 16, 512>}, {transform_indices = @transform_2, window_bounds = array<i64: 8, 8, 16>}, {transform_indices = @transform_3, window_bounds = array<i64: 4, 8, 512>}, {pipeline_mode = #tpu.pipeline_mode<synchronous>, transform_indices = @transform_4, window_bounds = array<i64: 1, 512>}, {pipeline_mode = #tpu.pipeline_mode<synchronous>, transform_indices = @transform_5, window_bounds = array<i64: 512, 256>}, {pipeline_mode = #tpu.pipeline_mode<synchronous>, transform_indices = @transform_6, window_bounds = array<i64: 1, 256>}, {pipeline_mode = #tpu.pipeline_mode<synchronous>, transform_indices = @transform_7, window_bounds = array<i64: 256, 6>}, {pipeline_mode = #tpu.pipeline_mode<synchronous>, transform_indices = @transform_8, window_bounds = array<i64: 2, 6>}]} {
    %c0_i32 = arith.constant 0 : i32
    %0 = arith.cmpi eq, %arg0, %c0_i32 : i32
    %1 = arith.extui %0 : i1 to i32
    %c0_i32_0 = arith.constant 0 : i32
    %2 = arith.cmpi ne, %1, %c0_i32_0 : i32
    scf.if %2 {
      %cst_30 = arith.constant 0.000000e+00 : f32
      %48 = vector.broadcast %cst_30 : f32 to vector<2x512xf32>
      %c0_31 = arith.constant 0 : index
      %c0_32 = arith.constant 0 : index
      %49 = vector.load %arg10[%c0_31, %c0_32] : memref<2x512xf32, #tpu.memory_space<vmem>>, vector<2x512xf32>
      tpu.vector_store %arg10[%c0_31, %c0_32], %48 {strides = array<i32>} : memref<2x512xf32, #tpu.memory_space<vmem>>, vector<2x512xf32>,
    } else {
    }
    %c0 = arith.constant 0 : index
    %c0_1 = arith.constant 0 : index
    %c0_2 = arith.constant 0 : index
    %3 = vector.load %arg3[%c0, %c0_1, %c0_2] : memref<8x8x16xf32, #tpu.memory_space<vmem>>, vector<8x8x16xf32>
    %4 = vector.extract_strided_slice %3 {offsets = [0, 0, 0], sizes = [8, 4, 16], strides = [1, 1, 1]} : vector<8x8x16xf32> to vector<8x4x16xf32>
    %5 = vector.extract_strided_slice %3 {offsets = [0, 4, 0], sizes = [8, 1, 16], strides = [1, 1, 1]} : vector<8x8x16xf32> to vector<8x1x16xf32>
    %6 = vector.extract_strided_slice %3 {offsets = [0, 5, 0], sizes = [8, 1, 4], strides = [1, 1, 1]} : vector<8x8x16xf32> to vector<8x1x4xf32>
    %c0_3 = arith.constant 0 : index
    %c0_4 = arith.constant 0 : index
    %c0_5 = arith.constant 0 : index
    %7 = vector.load %arg1[%c0_3, %c0_4, %c0_5] : memref<8x2x512xf32, #tpu.memory_space<vmem>>, vector<8x2x512xf32>
    %c0_6 = arith.constant 0 : index
    %c0_7 = arith.constant 0 : index
    %c0_8 = arith.constant 0 : index
    %8 = vector.load %arg2[%c0_6, %c0_7, %c0_8] : memref<8x16x512xf32, #tpu.memory_space<vmem>>, vector<8x16x512xf32>
    %cst = arith.constant dense<0.000000e+00> : vector<8x2x16xf32>
    %9 = tpu.matmul %7, %8, %cst {dimension_numbers = #tpu.dot_dimension_numbers<[2], [2], [1], [1], [0, 0, 0, 1, 1, 1], [0], [0]>} : vector<8x2x512xf32>, vector<8x16x512xf32>, vector<8x2x16xf32> -> vector<8x2x16xf32>
    %10 = vector.broadcast %5 : vector<8x1x16xf32> to vector<8x2x16xf32>
    %11 = arith.addf %9, %10 : vector<8x2x16xf32>
    %cst_9 = arith.constant 0.000000e+00 : f32
    %12 = vector.broadcast %cst_9 : f32 to vector<8x2x16xf32>
    %13 = arith.maximumf %11, %12 : vector<8x2x16xf32>
    %cst_10 = arith.constant dense<0.000000e+00> : vector<8x2x4xf32>
    %14 = tpu.matmul %13, %4, %cst_10 {dimension_numbers = #tpu.dot_dimension_numbers<[2], [2], [1], [1], [0, 0, 0, 1, 1, 1], [0], [0]>} : vector<8x2x16xf32>, vector<8x4x16xf32>, vector<8x2x4xf32> -> vector<8x2x4xf32>
    %15 = vector.broadcast %6 : vector<8x1x4xf32> to vector<8x2x4xf32>
    %16 = arith.addf %14, %15 : vector<8x2x4xf32>
    %cst_11 = arith.constant 0.000000e+00 : f32
    %17 = vector.broadcast %cst_11 : f32 to vector<8x2x4xf32>
    %18 = arith.maximumf %16, %17 : vector<8x2x4xf32>
    %19 = vector.extract_strided_slice %18 {offsets = [0, 0, 0], sizes = [8, 2, 1], strides = [1, 1, 1]} : vector<8x2x4xf32> to vector<8x2x1xf32>
    %20 = vector.shape_cast %19 : vector<8x2x1xf32> to vector<8x2xf32>
    %c0_12 = arith.constant 0 : index
    %c0_13 = arith.constant 0 : index
    %c0_14 = arith.constant 0 : index
    %21 = vector.load %arg4[%c0_12, %c0_13, %c0_14] : memref<4x8x512xf32, #tpu.memory_space<vmem>>, vector<1x8x512xf32>
    %22 = vector.shape_cast %21 : vector<1x8x512xf32> to vector<8x512xf32>
    %cst_15 = arith.constant dense<0.000000e+00> : vector<2x512xf32>
    %23 = tpu.matmul %20, %22, %cst_15 {dimension_numbers = #tpu.dot_dimension_numbers<[0], [0], [1], [1], [0, 1, 1, 1], [], []>} : vector<8x2xf32>, vector<8x512xf32>, vector<2x512xf32> -> vector<2x512xf32>
    %24 = vector.extract_strided_slice %18 {offsets = [0, 0, 1], sizes = [8, 2, 1], strides = [1, 1, 1]} : vector<8x2x4xf32> to vector<8x2x1xf32>
    %25 = vector.shape_cast %24 : vector<8x2x1xf32> to vector<8x2xf32>
    %c1 = arith.constant 1 : index
    %c0_16 = arith.constant 0 : index
    %c0_17 = arith.constant 0 : index
    %26 = vector.load %arg4[%c1, %c0_16, %c0_17] : memref<4x8x512xf32, #tpu.memory_space<vmem>>, vector<1x8x512xf32>
    %27 = vector.shape_cast %26 : vector<1x8x512xf32> to vector<8x512xf32>
    %cst_18 = arith.constant dense<0.000000e+00> : vector<2x512xf32>
    %28 = tpu.matmul %25, %27, %cst_18 {dimension_numbers = #tpu.dot_dimension_numbers<[0], [0], [1], [1], [0, 1, 1, 1], [], []>} : vector<8x2xf32>, vector<8x512xf32>, vector<2x512xf32> -> vector<2x512xf32>
    %29 = arith.addf %23, %28 : vector<2x512xf32>
    %30 = vector.extract_strided_slice %18 {offsets = [0, 0, 2], sizes = [8, 2, 1], strides = [1, 1, 1]} : vector<8x2x4xf32> to vector<8x2x1xf32>
    %31 = vector.shape_cast %30 : vector<8x2x1xf32> to vector<8x2xf32>
    %c2 = arith.constant 2 : index
    %c0_19 = arith.constant 0 : index
    %c0_20 = arith.constant 0 : index
    %32 = vector.load %arg4[%c2, %c0_19, %c0_20] : memref<4x8x512xf32, #tpu.memory_space<vmem>>, vector<1x8x512xf32>
    %33 = vector.shape_cast %32 : vector<1x8x512xf32> to vector<8x512xf32>
    %cst_21 = arith.constant dense<0.000000e+00> : vector<2x512xf32>
    %34 = tpu.matmul %31, %33, %cst_21 {dimension_numbers = #tpu.dot_dimension_numbers<[0], [0], [1], [1], [0, 1, 1, 1], [], []>} : vector<8x2xf32>, vector<8x512xf32>, vector<2x512xf32> -> vector<2x512xf32>
    %35 = arith.addf %29, %34 : vector<2x512xf32>
    %36 = vector.extract_strided_slice %18 {offsets = [0, 0, 3], sizes = [8, 2, 1], strides = [1, 1, 1]} : vector<8x2x4xf32> to vector<8x2x1xf32>
    %37 = vector.shape_cast %36 : vector<8x2x1xf32> to vector<8x2xf32>
    %c3 = arith.constant 3 : index
    %c0_22 = arith.constant 0 : index
    %c0_23 = arith.constant 0 : index
    %38 = vector.load %arg4[%c3, %c0_22, %c0_23] : memref<4x8x512xf32, #tpu.memory_space<vmem>>, vector<1x8x512xf32>
    %39 = vector.shape_cast %38 : vector<1x8x512xf32> to vector<8x512xf32>
    %cst_24 = arith.constant dense<0.000000e+00> : vector<2x512xf32>
    %40 = tpu.matmul %37, %39, %cst_24 {dimension_numbers = #tpu.dot_dimension_numbers<[0], [0], [1], [1], [0, 1, 1, 1], [], []>} : vector<8x2xf32>, vector<8x512xf32>, vector<2x512xf32> -> vector<2x512xf32>
    %41 = arith.addf %35, %40 : vector<2x512xf32>
    %c0_25 = arith.constant 0 : index
    %c0_26 = arith.constant 0 : index
    %42 = vector.load %arg10[%c0_25, %c0_26] : memref<2x512xf32, #tpu.memory_space<vmem>>, vector<2x512xf32>
    %43 = arith.addf %42, %41 : vector<2x512xf32>
    %c0_27 = arith.constant 0 : index
    %c0_28 = arith.constant 0 : index
    %44 = vector.load %arg10[%c0_27, %c0_28] : memref<2x512xf32, #tpu.memory_space<vmem>>, vector<2x512xf32>
    tpu.vector_store %arg10[%c0_27, %c0_28], %43 {strides = array<i32>} : memref<2x512xf32, #tpu.memory_space<vmem>>, vector<2x512xf32>,
    %c2_i32 = arith.constant 2 : i32
    %45 = arith.cmpi eq, %arg0, %c2_i32 : i32
    %46 = arith.extui %45 : i1 to i32
    %c0_i32_29 = arith.constant 0 : i32
    %47 = arith.cmpi ne, %46, %c0_i32_29 : i32
    scf.if %47 {
      %c0_30 = arith.constant 0 : index
      %c0_31 = arith.constant 0 : index
      %48 = vector.load %arg10[%c0_30, %c0_31] : memref<2x512xf32, #tpu.memory_space<vmem>>, vector<2x512xf32>
      %c0_32 = arith.constant 0 : index
      %c0_33 = arith.constant 0 : index
      %49 = vector.load %arg5[%c0_32, %c0_33] : memref<1x512xf32, #tpu.memory_space<vmem>>, vector<1x512xf32>
      %50 = vector.broadcast %49 : vector<1x512xf32> to vector<2x512xf32>
      %51 = arith.addf %48, %50 : vector<2x512xf32>
      %cst_34 = arith.constant 0.000000e+00 : f32
      %52 = vector.broadcast %cst_34 : f32 to vector<2x512xf32>
      %53 = arith.maximumf %51, %52 : vector<2x512xf32>
      %c0_35 = arith.constant 0 : index
      %c0_36 = arith.constant 0 : index
      %54 = vector.load %arg6[%c0_35, %c0_36] : memref<512x256xf32, #tpu.memory_space<vmem>>, vector<512x256xf32>
      %cst_37 = arith.constant dense<0.000000e+00> : vector<2x256xf32>
      %55 = tpu.matmul %53, %54, %cst_37 {dimension_numbers = #tpu.dot_dimension_numbers<[1], [0], [0], [1], [0, 0, 1, 1], [], []>} : vector<2x512xf32>, vector<512x256xf32>, vector<2x256xf32> -> vector<2x256xf32>
      %c0_38 = arith.constant 0 : index
      %c0_39 = arith.constant 0 : index
      %56 = vector.load %arg7[%c0_38, %c0_39] : memref<1x256xf32, #tpu.memory_space<vmem>>, vector<1x256xf32>
      %57 = vector.broadcast %56 : vector<1x256xf32> to vector<2x256xf32>
      %58 = arith.addf %55, %57 : vector<2x256xf32>
      %cst_40 = arith.constant 0.000000e+00 : f32
      %59 = vector.broadcast %cst_40 : f32 to vector<2x256xf32>
      %60 = arith.maximumf %58, %59 : vector<2x256xf32>
      %c0_41 = arith.constant 0 : index
      %c0_42 = arith.constant 0 : index
      %61 = vector.load %arg8[%c0_41, %c0_42] : memref<256x6xf32, #tpu.memory_space<vmem>>, vector<256x6xf32>
      %cst_43 = arith.constant dense<0.000000e+00> : vector<2x6xf32>
      %62 = tpu.matmul %60, %61, %cst_43 {dimension_numbers = #tpu.dot_dimension_numbers<[1], [0], [0], [1], [0, 0, 1, 1], [], []>} : vector<2x256xf32>, vector<256x6xf32>, vector<2x6xf32> -> vector<2x6xf32>
      %cst_44 = arith.constant 0.000000e+00 : f32
      %cst_45 = arith.constant 6.000000e+00 : f32
      %63 = vector.broadcast %cst_44 : f32 to vector<2x6xf32>
      %64 = arith.maximumf %63, %62 : vector<2x6xf32>
      %65 = vector.broadcast %cst_45 : f32 to vector<2x6xf32>
      %66 = arith.minimumf %65, %64 : vector<2x6xf32>
      %c0_46 = arith.constant 0 : index
      %c0_47 = arith.constant 0 : index
      %67 = vector.load %arg9[%c0_46, %c0_47] : memref<2x6xf32, #tpu.memory_space<vmem>>, vector<2x6xf32>
      tpu.vector_store %arg9[%c0_46, %c0_47], %66 {strides = array<i32>} : memref<2x6xf32, #tpu.memory_space<vmem>>, vector<2x6xf32>,
    } else {
    }
    return
  }
  func.func @transform_0(%arg0: i32) -> (i32, i32, i32) {
    %c0_i32 = arith.constant 0 : i32
    %c0_i32_0 = arith.constant 0 : i32
    %c0_i32_1 = arith.constant 0 : i32
    return %arg0, %c0_i32, %c0_i32_0 : i32, i32, i32
  }
  func.func @transform_1(%arg0: i32) -> (i32, i32, i32) {
    %c0_i32 = arith.constant 0 : i32
    %c0_i32_0 = arith.constant 0 : i32
    %c0_i32_1 = arith.constant 0 : i32
    return %arg0, %c0_i32, %c0_i32_0 : i32, i32, i32
  }
  func.func @transform_2(%arg0: i32) -> (i32, i32, i32) {
    %c0_i32 = arith.constant 0 : i32
    %c0_i32_0 = arith.constant 0 : i32
    %c0_i32_1 = arith.constant 0 : i32
    return %arg0, %c0_i32, %c0_i32_0 : i32, i32, i32
  }
  func.func @transform_3(%arg0: i32) -> (i32, i32, i32) {
    %c0_i32 = arith.constant 0 : i32
    %c0_i32_0 = arith.constant 0 : i32
    %c0_i32_1 = arith.constant 0 : i32
    return %c0_i32, %arg0, %c0_i32_0 : i32, i32, i32
  }
  func.func @transform_4(%arg0: i32) -> (i32, i32) {
    %c0_i32 = arith.constant 0 : i32
    %c0_i32_0 = arith.constant 0 : i32
    %c0_i32_1 = arith.constant 0 : i32
    return %c0_i32, %c0_i32_0 : i32, i32
  }
  func.func @transform_5(%arg0: i32) -> (i32, i32) {
    %c0_i32 = arith.constant 0 : i32
    %c0_i32_0 = arith.constant 0 : i32
    %c0_i32_1 = arith.constant 0 : i32
    return %c0_i32, %c0_i32_0 : i32, i32
  }
  func.func @transform_6(%arg0: i32) -> (i32, i32) {
    %c0_i32 = arith.constant 0 : i32
    %c0_i32_0 = arith.constant 0 : i32
    %c0_i32_1 = arith.constant 0 : i32
    return %c0_i32, %c0_i32_0 : i32, i32
  }
  func.func @transform_7(%arg0: i32) -> (i32, i32) {
    %c0_i32 = arith.constant 0 : i32
    %c0_i32_0 = arith.constant 0 : i32
    %c0_i32_1 = arith.constant 0 : i32
    return %c0_i32, %c0_i32_0 : i32, i32
  }
  func.func @transform_8(%arg0: i32) -> (i32, i32) {
    %c0_i32 = arith.constant 0 : i32
    %c0_i32_0 = arith.constant 0 : i32
    %c0_i32_1 = arith.constant 0 : i32
    return %c0_i32, %c0_i32_0 : i32, i32
  }
}

</mosaic_0001>

<bundles_post_ra>
// kernel: _lambda_.1
= control target key start
LH: loop header
LB: loop body
LE: loop exit
PB: predicated region body
PF: predicated region fallthrough
CT: control target
= control target key end

     0   :  { %13 = vsyncpa [#allocation4], 0  ;;  %s5500_s0 = inlined_call_operand.vmem [shape: f32[24,2,512], index: 0, kind: input, shape index: {}]   ;;  %s5501_s1 = inlined_call_operand.hbm [shape: f32[24,16,512], index: 1, kind: input, shape index: {}]   ;;  %s5502_s2 = inlined_call_operand.vmem [shape: f32[24,8,16], index: 2, kind: input, shape index: {}]   ;;  %s5503_s3 = inlined_call_operand.vmem [shape: f32[4,24,512], index: 3, kind: input, shape index: {}]   ;;  %s5504_s4 = inlined_call_operand.vmem [shape: f32[1,512], index: 4, kind: input, shape index: {}]   ;;  %s5505_s5 = inlined_call_operand.hbm [shape: f32[512,256], index: 5, kind: input, shape index: {}]   ;;  %s5506_s6 = inlined_call_operand.vmem [shape: f32[1,256], index: 6, kind: input, shape index: {}]   ;;  %s5507_s7 = inlined_call_operand.vmem [shape: f32[256,6], index: 7, kind: input, shape index: {}]   ;;  %s5508_s8 = inlined_call_operand.hbm [shape: f32[2,6], index: 8, kind: output, shape index: {}]  }
   0x1   :  { %15 = vsyncpa [#allocation4 + $0x1], 0 }
   0x2   :  { %16 = vsyncpa [#allocation8], 0 }
   0x3   :  { %17 = vsyncpa [#allocation5], 0  ;;  %s4817_s27 = smov 0   ;;  %s4819_s28 = smov 0  }
   0x4   :  { %s4821_s29 = smov 0   ;;  %s4823_s30 = smov 0  }
   0x5 LB: > { %s4836_s9 = sadd.s32 4294967295, %s4755_s30   ;;  %s4839_s10 = sadd.s32 1, %s4755_s30   ;;  %s4755_s30 = sphi %s4823_s30, %s5526_s30   ;;  %s4751_s29 = sphi %s4821_s29, %s5525_s29   ;;  %s4747_s28 = sphi %s4819_s28, %s5524_s28   ;;  %s4743_s27 = sphi %s4817_s27, %s5523_s27  }
   0x6   : > { %s53_s11 = ssub.s32 %s4755_s30, %s4839_s10  ;;  %s56_s12 = sadd.s32 1, %s4751_s29 }
   0x7   : > { %p54_p0 = scmp.eq.s32.totalorder %s53_s11, 0  ;;  %p63_p1 = scmp.ne.s32.totalorder %s4751_s29, %s4747_s28 }
   0x8   : > { %p64_p2 = scmp.eq.s32.totalorder %s4755_s30, 0  ;;  %p69_p3 = scmp.ne.s32.totalorder %s4747_s28, %s4743_s27 }
   0x9   : > { %s4849_s13 = scalar_select %p54_p0, %s4751_s29, %s56_s12  }
   0xa   : > { %p4851_p4 = por %p64_p2, %p63_p1  ;;  %p5509_p5 = scmp.eq.s32.totalorder %s4836_s9, 0 }
   0xb   : > { %p4115_p6 = scmp.ge.s32.totalorder %s4755_s30, 1  ;;  %p237_p7 = scmp.lt.s32.totalorder %s4755_s30, 4 }
   0xc   : > { %s5513_s14 = scalar_select %p4851_p4, 1, 0 }
   0xd   : > { %p4860_p8 = por %p5509_p5, %p69_p3  ;;  %p4865_p10 = pnand %p4115_p6, %p237_p7 }
   0xe   : > { %s4757_s17 = smov [#allocation7]   ;;  %s4631_s22 = scalar_lea.hbm %s5505_s5, 16384 }
   0xf   : > { %s5514_s15 = scalar_select %p4860_p8, 1, 0 }
  0x10   : > { %s5515_s16 = scalar_select %p4865_p10, 1, 0 }
  0x11   : > { %s252_s18 = sshll.u32 %s4757_s17, 4  ;;  %p4545_p11 = pneg %p4865_p10  ;;  %s253_s18 = int_to_ptr.vmem [resolvable:$true] %s252_s18 }
  0x12   : > { %p4632_p13 = scmp.ne.s32.totalorder %s5505_s5, %s4631_s22  ;;  %p4638_p3 = scmp.lt.u32.totalorder %s4631_s22, %s5505_s5 }
  0x13   : > { %p4873_p12 = pnand %p4545_p11, %p5509_p5 }
  0x15   : > { %p4633_p0 = pneg %p4873_p12 }
  0x17   : > { %p4634_p1 = pnand %p4633_p0, %p4632_p13 }
  0x19   : > { %p4635_p2 = pneg %p4634_p1 }
  0x1b   : > { %p4640_p6 = pnand %p4638_p3, %p4635_p2 }
  0x1d   : > { %4643 = shalt.err (!%p4640_p6)
}
  0x1e   : > { %s4644_s27 = scalar_lea.vmem %s253_s18, 16384  ;;  %p4652_p5 = scmp.lt.s32.totalorder %s253_s18, %s253_s18 }
  0x1f   : > { %p4645_p7 = scmp.ne.s32.totalorder %s253_s18, %s4644_s27  ;;  %p4653_p8 = scmp.lt.s32.totalorder %s4644_s27, %s4644_s27 }
  0x21   : > { %p4647_p11 = pnand %p4645_p7, %p4633_p0  ;;  %p4654_p10 = por %p4653_p8, %p4652_p5 }
  0x23   : > { %p4648_p9 = pneg %p4647_p11 }
  0x25   : > { %p4655_p4 = pnand %p4654_p10, %p4648_p9 }
  0x27   : > { %4658 = shalt.err (!%p4655_p4)
}
  0x28   : > { %s4758_s11 = smov 256   ;;  %s4759_s12 = smov 16  }
  0x29   : > { %4548 = dma.hbm_to_vmem [thread:$0]  (!%p4873_p12), %s5505_s5, 16384, %s253_s18, [#allocation8], %s4758_s11, %s4758_s11, %s4759_s12  }
  0x2a   : > { %p4117_p13 = scmp.ge.s32.totalorder %s4755_s30, 3 }
  0x2b   : > { %s4895_s21 = sand.u32 (!%p4117_p13), 1, %s4751_s29   ;;  %s4177_s22 = sshll.u32 (!%p4117_p13), %s4755_s30, 13 }
  0x2c   : > { %268 = sbr.rel (%p4117_p13) target bundleno = 82 (0x52), region = 32  ;;  %s4118_s23 = sshll.u32 (!%p4117_p13), %s4895_s21, 9 }
  0x2d   : > { %s4902_s19 = scalar_lea.hbm (!%p4117_p13), %s5501_s1, %s4177_s22  ;;  %s286_s18 = scalar_lea.vmem (!%p4117_p13), [#allocation3], %s4118_s23 }
  0x2e   : > { %s294_s26 = sshll.u32 (!%p4117_p13), %s286_s18, 4  ;;  %s283_s27 = scalar_lea.sflag (!%p4117_p13), [#allocation4], %s4895_s21  ;;  %s4904_s26 = int_to_ptr.vmem [resolvable:$true] %s294_s26 }
  0x2f   : > { %s4659_s11 = scalar_lea.hbm (!%p4117_p13), %s4902_s19, 8192  ;;  %p5517_p5 = scmp.ne.s32.totalorder (!%p4117_p13), %s5513_s14, 0 }
  0x30   : > { %p4660_p4 = scmp.ne.s32.totalorder (!%p4117_p13), %s4902_s19, %s4659_s11  ;;  %s4663_s20 = scalar_lea.hbm (!%p4117_p13), %s5501_s1, 24576 }
  0x31   : > { %p4664_p10 = scmp.lt.u32.totalorder (!%p4117_p13), %s4902_s19, %s5501_s1  ;;  %p4665_p12 = scmp.lt.u32.totalorder (!%p4117_p13), %s4663_s20, %s4659_s11 }
  0x32   : > { %p4661_p8 = pnand (!%p4117_p13), %p4660_p4, %p5517_p5  ;;  %p4667_p1 = scmp.lt.u32.totalorder (!%p4117_p13), %s4659_s11, %s4902_s19 }
  0x33   : > { %p4666_p0 = por %p4665_p12, %p4664_p10 }
  0x34   : > { %p4662_p9 = pneg %p4661_p8 }
  0x35   : > { %p4668_p2 = por %p4667_p1, %p4666_p0 }
  0x37   : > { %p4669_p3 = pnand %p4668_p2, %p4662_p9 }
  0x39   : > { %4672 = shalt.err (!%p4669_p3)
}
  0x3a   : > { %s4673_s23 = scalar_lea.vmem %s4904_s26, 8192  ;;  %s4760_s25 = smov [#allocation3]  }
  0x3b   : > { %p4674_p6 = scmp.ne.s32.totalorder %s4904_s26, %s4673_s23  ;;  %s4677_s18 = sshll.u32 %s4760_s25, 4  ;;  %s4678_s18 = int_to_ptr.vmem [resolvable:$false] %s4677_s18 }
  0x3c   : > { %s4679_s12 = scalar_lea.vmem %s4678_s18, 16384  ;;  %p4680_p13 = scmp.lt.s32.totalorder %s4904_s26, %s4678_s18 }
  0x3d   : > { %p4675_p7 = pnand %p4674_p6, %p5517_p5  ;;  %p4681_p4 = scmp.lt.s32.totalorder %s4679_s12, %s4673_s23 }
  0x3f   : > { %p4676_p11 = pneg %p4675_p7  ;;  %p4682_p8 = por %p4681_p4, %p4680_p13 }
  0x41   : > { %p4683_p10 = pnand %p4682_p8, %p4676_p11 }
  0x43   : > { %4686 = shalt.err (!%p4683_p10)
}
  0x44   : > { %s4761_s11 = smov 512   ;;  %s4762_s17 = smov 32  }
  0x45   : > { %4537 = dma.hbm_to_vmem [thread:$0]  (%p5517_p5), %s4902_s19, 8192, %s4904_s26, %s283_s27, %s4761_s11, %s4761_s11, %s4762_s17  }
  0x46   : > { %312 = sbr.rel (!%p5517_p5) target bundleno = 82 (0x52), region = 48  ;;  %s4122_s20 = sshll.u32 (%p5517_p5), %s4895_s21, 7 }
  0x47   : > { %s4178_s22 = sshll.u32 (%p5517_p5), %s4755_s30, 5  ;;  %s316_s14 = scalar_lea.vmem (%p5517_p5), [#allocation6], %s4122_s20 }
  0x48   : > { %s4937_s25 = scalar_lea.vmem (%p5517_p5), %s5503_s3, %s4178_s22 }
  0x49   : > { %v332_v0 = vld [vmem:[%s4937_s25] sm:$0xff] (%p5517_p5)  ;;  %v334_v1 = vld [vmem:[%s4937_s25 + $0x8] sm:$0xff] (%p5517_p5)  ;;  %v336_v2 = vld [vmem:[%s4937_s25 + $0x10] sm:$0xff] (%p5517_p5) }
  0x4a   : > { %333 = vst [vmem:[%s316_s14] sm:$0xff] (%p5517_p5), %v332_v0  ;;  %335 = vst [vmem:[%s316_s14 + $0x8] sm:$0xff] (%p5517_p5), %v334_v1  ;;  %v338_v3 = vld [vmem:[%s4937_s25 + $0x18] sm:$0xff] (%p5517_p5)  ;;  %v340_v4 = vld [vmem:[%s4937_s25 + $0x60] sm:$0xff] (%p5517_p5) }
  0x4b   : > { %337 = vst [vmem:[%s316_s14 + $0x10] sm:$0xff] (%p5517_p5), %v336_v2  ;;  %v342_v5 = vld [vmem:[%s4937_s25 + $0x68] sm:$0xff] (%p5517_p5)  ;;  %339 = vst [vmem:[%s316_s14 + $0x18] sm:$0xff] (%p5517_p5), %v338_v3  ;;  %v344_v6 = vld [vmem:[%s4937_s25 + $0x70] sm:$0xff] (%p5517_p5) }
  0x4c   : > { %341 = vst [vmem:[%s316_s14 + $0x20] sm:$0xff] (%p5517_p5), %v340_v4  ;;  %343 = vst [vmem:[%s316_s14 + $0x28] sm:$0xff] (%p5517_p5), %v342_v5  ;;  %v346_v7 = vld [vmem:[%s4937_s25 + $0x78] sm:$0xff] (%p5517_p5)  ;;  %v348_v8 = vld [vmem:[%s4937_s25 + $0xc0] sm:$0xff] (%p5517_p5) }
  0x4d   : > { %345 = vst [vmem:[%s316_s14 + $0x30] sm:$0xff] %v344_v6  ;;  %347 = vst [vmem:[%s316_s14 + $0x38] sm:$0xff] %v346_v7  ;;  %v350_v9 = vld [vmem:[%s4937_s25 + $0xc8] sm:$0xff]  ;;  %v352_v10 = vld [vmem:[%s4937_s25 + $0xd0] sm:$0xff] }
  0x4e   : > { %349 = vst [vmem:[%s316_s14 + $0x40] sm:$0xff] %v348_v8  ;;  %v354_v11 = vld [vmem:[%s4937_s25 + $0xd8] sm:$0xff]  ;;  %351 = vst [vmem:[%s316_s14 + $0x48] sm:$0xff] %v350_v9  ;;  %v356_v12 = vld [vmem:[%s4937_s25 + $0x120] sm:$0xff] }
  0x4f   : > { %353 = vst [vmem:[%s316_s14 + $0x50] sm:$0xff] %v352_v10  ;;  %355 = vst [vmem:[%s316_s14 + $0x58] sm:$0xff] %v354_v11  ;;  %v358_v13 = vld [vmem:[%s4937_s25 + $0x128] sm:$0xff]  ;;  %v360_v14 = vld [vmem:[%s4937_s25 + $0x130] sm:$0xff] }
  0x50   : > { %357 = vst [vmem:[%s316_s14 + $0x60] sm:$0xff] %v356_v12  ;;  %359 = vst [vmem:[%s316_s14 + $0x68] sm:$0xff] %v358_v13  ;;  %v362_v15 = vld [vmem:[%s4937_s25 + $0x138] sm:$0xff] }
  0x51   : > { %361 = vst [vmem:[%s316_s14 + $0x70] sm:$0xff] %v360_v14  ;;  %363 = vst [vmem:[%s316_s14 + $0x78] sm:$0xff] %v362_v15 }
  0x52 PF: > { %p5518_p5 = scmp.ne.s32.totalorder %s5515_s16, 0 }
  0x53   : > { %s374_s30 = sand.u32 (!%p5518_p5), 1, %s4747_s28   ;;  %p5519_p9 = scmp.ne.s32.totalorder (!%p5518_p5), %s5514_s15, 0 }
  0x54   : > { %372 = sbr.rel (%p5518_p5) target bundleno = 1633 (0x661), region = 71  ;;  %s4126_s21 = sshll.u32 (!%p5518_p5), %s374_s30, 9 }
  0x55   : > { %s375_s19 = scalar_lea.sflag (!%p5518_p5), [#allocation4], %s374_s30  ;;  %s4958_s26 = scalar_lea.vmem (!%p5518_p5), [#allocation3], %s4126_s21 }
  0x5b   : > { %4730 = dma.done.wait (%p5519_p9), %s375_s19, 8192  }
  0x5c   : > { %4732 = vsyncadd (%p5519_p9), %s375_s19, 4294959104  ;;  %s4127_s27 = sshll.u32 %s374_s30, 7  ;;  %p5520_p12 = scmp.eq.s32.totalorder %s4836_s9, 0 }
  0x5d   : > { %s4964_s18 = scalar_lea.vmem [#allocation6], %s4127_s27 }
  0x5e   : > { %4734 = dma.done.wait (%p5520_p12), [#allocation8], 16384   ;;  %p5521_p0 = pmov %p5520_p12 }
  0x5f   : > { %s4129_s16 = sshll.u32 %s4836_s9, 3  ;;  %p5522_p2 = scmp.ne.s32.totalorder %s4836_s9, 0 }
  0x60   : > { %4736 = vsyncadd (%p5521_p0), [#allocation8], 4294950912  ;;  %p433_p1 = scmp.lt.s32.totalorder %s4129_s16, 23  ;;  %v4763_v16 = vmov (!%p5522_p2), 0.0  }
  0x61   : > { %449 = sbr.rel (%p5522_p2) target bundleno = 104 (0x68), region = 87  ;;  %450 = vst [vmem:[#allocation2] sm:$0xff] (!%p5522_p2), %v4763_v16 }
  0x62   : > { %s5528_s16 = smov (!%p433_p1, %s4129_s16), 23 }
  0x63   : > { %s4179_s12 = sshll.u32 %s5528_s16, 3 }
  0x64   : > { %s4974_s20 = scalar_lea.vmem %s5500_s0, %s4179_s12  ;;  %s4979_s24 = scalar_lea.vmem %s5502_s2, %s4179_s12 }
  0x68 PF: > { %v468_v17 = vld [vmem:[%s4958_s26 + $0x8] sm:$0xff]  ;;  %v531_v20 = vlaneseq  ;;  %v467_v23 = vld [vmem:[%s4958_s26] sm:$0xff]  ;;  %v4764_v25 = vmov 1983009808   ;;  %v459_v31 = vld [vmem:[%s4974_s20] sm:$0xff]  ;;  %vm1899_vm0 = vcmask 130048  }
  0x69   : > { %v472_v18 = vld [vmem:[%s4958_s26 + $0x28] sm:$0xff]  ;;  %v471_v24 = vld [vmem:[%s4958_s26 + $0x20] sm:$0xff]  ;;  %v566_v26 = vunpack.c.l.s4 %v4764_v25  ;;  %v564_v34 = vcombine.high %v459_v31, %v459_v31  ;;  %v470_v36 = vld [vmem:[%s4958_s26 + $0x18] sm:$0xff]  ;;  %vm4766_vm1 = vmmov 0   ;;  %vm2591_vm2 = vcmask 1041409   ;;  %p4171_p3 = scmp.ne.s32.totalorder %s4836_s9, 2 }
  0x6a   : > { %v476_v19 = vld [vmem:[%s4958_s26 + $0x48] sm:$0xff]  ;;  %v4271_v21 = vpack.c.bf16 %v472_v18, %v468_v17  ;;  %v4273_v28 = vpack.c.bf16 %v471_v24, %v467_v23  ;;  %v475_v29 = vld [vmem:[%s4958_s26 + $0x40] sm:$0xff]  ;;  %v4993_v32 = vshrl.u32 %v531_v20, 7  ;;  %v474_v37 = vld [vmem:[%s4958_s26 + $0x38] sm:$0xff]  ;;  %vm2593_vm3 = vcmask 1042434  }
  0x6b   : > { %v480_v22 = vld [vmem:[%s4958_s26 + $0x68] sm:$0xff]  ;;  %v479_v30 = vld [vmem:[%s4958_s26 + $0x60] sm:$0xff]  ;;  %v567_v35 = vunpack.c.0.s8 %v566_v26  ;;  %v4275_v39 = vpack.c.bf16 %v474_v37, %v470_v36  ;;  %v478_v41 = vld [vmem:[%s4958_s26 + $0x58] sm:$0xff]  ;;  %vm2595_vm4 = vcmask 1043459   ;;  %vm2597_vm5 = vcmask 1044484  }
  0x6c   : > { %v4279_v27 = vpack.c.bf16 %v480_v22, %v476_v19  ;;  %4272 = vmatprep.subr.bf16.mxu0 %v4271_v21  ;;  %v4281_v33 = vpack.c.bf16 %v479_v30, %v475_v29  ;;  %v460_v38 = vld [vmem:[%s4974_s20 + $0x8] sm:$0xff]  ;;  %v482_v42 = vld [vmem:[%s4958_s26 + $0x78] sm:$0xff]  ;;  %v469_v45 = vld [vmem:[%s4958_s26 + $0x10] sm:$0xff]  ;;  %vm2599_vm6 = vcmask 1045509   ;;  %vm2601_vm7 = vcmask 1046534  }
  0x6d   : > { %4274 = vmatpush1.bf16.xpose.msra.mxu0 %v4273_v28  ;;  %v726_v40 = vcombine.high %v460_v38, %v460_v38  ;;  %v5001_v43 = vsub.s32 %v567_v35, %v4993_v32  ;;  %v4283_v44 = vpack.c.bf16 %v482_v42, %v478_v41  ;;  %v473_v46 = vld [vmem:[%s4958_s26 + $0x30] sm:$0xff]  ;;  %v484_v53 = vld [vmem:[%s4958_s26 + $0x88] sm:$0xff]  ;;  %v483_v3 = vld [vmem:[%s4958_s26 + $0x80] sm:$0xff]  ;;  %vm2603_vm8 = vcmask 1047559  }
  0x6e   : > { %4280 = vmatprep.subr.bf16.mxu1 %v4279_v27  ;;  %4276 = vmatprep.subr.bf16.mxu0 %v4275_v39  ;;  %v477_v47 = vld [vmem:[%s4958_s26 + $0x50] sm:$0xff]  ;;  %v488_v54 = vld [vmem:[%s4958_s26 + $0xa8] sm:$0xff]  ;;  %v4277_v59 = vpack.c.bf16 %v473_v46, %v469_v45  ;;  %v487_v4 = vld [vmem:[%s4958_s26 + $0xa0] sm:$0xff]  ;;  %vm2638_vm9 = vcmask 64512   ;;  %vm4003_vm10 = vcmask (!%p4171_p3), 41984  }
  0x6f   : > { %4282 = vmatpush1.bf16.xpose.msra.mxu1 %v4281_v33  ;;  %v481_v48 = vld [vmem:[%s4958_s26 + $0x70] sm:$0xff]  ;;  %v571_v49 = vrot.slane %v459_v31, %v5001_v43  ;;  %v733_v50 = vrot.slane %v460_v38, %v5001_v43  ;;  %v578_v51 = vrot.slane %v564_v34, %v5001_v43  ;;  %v740_v52 = vrot.slane %v726_v40, %v5001_v43  ;;  %v492_v55 = vld [vmem:[%s4958_s26 + $0xc8] sm:$0xff]  ;;  %v491_v5 = vld [vmem:[%s4958_s26 + $0xc0] sm:$0xff] }
  0x70   : > { %4284 = vmatprep.subr.bf16.mxu1 %v4283_v44  ;;  %v496_v56 = vld [vmem:[%s4958_s26 + $0xe8] sm:$0xff]  ;;  %v4285_v60 = vpack.c.bf16 %v481_v48, %v477_v47  ;;  %v4287_v63 = vpack.c.bf16 %v488_v54, %v484_v53  ;;  %v462_v2 = vld [vmem:[%s4974_s20 + $0x18] sm:$0xff]  ;;  %v495_v6 = vld [vmem:[%s4958_s26 + $0xe0] sm:$0xff]  ;;  %v4289_v13 = vpack.c.bf16 %v487_v4, %v483_v3 }
  0x71   : > { %v579_v57 = vcombine.high %v571_v49, %v571_v49  ;;  %v741_v58 = vcombine.high %v733_v50, %v733_v50  ;;  %v580_v61 = vcombine.high %v578_v51, %v578_v51  ;;  %v742_v62 = vcombine.high %v740_v52, %v740_v52  ;;  %v461_v1 = vld [vmem:[%s4974_s20 + $0x10] sm:$0xff]  ;;  %v486_v9 = vld [vmem:[%s4958_s26 + $0x98] sm:$0xff]  ;;  %v485_v22 = vld [vmem:[%s4958_s26 + $0x90] sm:$0xff] }
  0x72   : > { %v4295_v0 = vpack.c.bf16 %v496_v56, %v492_v55  ;;  %v895_v7 = vrot.slane %v461_v1, %v5001_v43  ;;  %v1057_v8 = vrot.slane %v462_v2, %v5001_v43  ;;  %v490_v10 = vld [vmem:[%s4958_s26 + $0xb8] sm:$0xff]  ;;  %v4297_v14 = vpack.c.bf16 %v495_v6, %v491_v5  ;;  %v489_v23 = vld [vmem:[%s4958_s26 + $0xb0] sm:$0xff]  ;;  %v500_v28 = vld [vmem:[%s4958_s26 + $0x108] sm:$0xff] }
  0x73   : > { %649 = vmatprep.mubr.f32.mxu0 %v579_v57  ;;  %811 = vmatprep.mubr.f32.mxu1 %v741_v58  ;;  %v494_v11 = vld [vmem:[%s4958_s26 + $0xd8] sm:$0xff]  ;;  %v888_v17 = vcombine.high %v461_v1, %v461_v1  ;;  %v1050_v18 = vcombine.high %v462_v2, %v462_v2  ;;  %v4291_v19 = vpack.c.bf16 %v490_v10, %v486_v9  ;;  %v493_v24 = vld [vmem:[%s4958_s26 + $0xd0] sm:$0xff]  ;;  %v504_v29 = vld [vmem:[%s4958_s26 + $0x128] sm:$0xff] }
  0x74   : > { %650 = vmatmul.mubr.f32.vlgmr.msra.gmra.mrb[0].mxu0 %v571_v49  ;;  %v498_v12 = vld [vmem:[%s4958_s26 + $0xf8] sm:$0xff]  ;;  %v903_v15 = vcombine.high %v895_v7, %v895_v7  ;;  %v1065_v16 = vcombine.high %v1057_v8, %v1057_v8  ;;  %v497_v25 = vld [vmem:[%s4958_s26 + $0xf0] sm:$0xff]  ;;  %v508_v30 = vld [vmem:[%s4958_s26 + $0x148] sm:$0xff]  ;;  %v4293_v33 = vpack.c.bf16 %v489_v23, %v485_v22  ;;  %v4303_v37 = vpack.c.bf16 %v504_v29, %v500_v28 }
  0x75   : > { %4278 = vmatpush1.bf16.xpose.msra.mxu0 %v4277_v59  ;;  %719 = vmatprep.mubr.f32.mxu0 %v580_v61  ;;  %v4299_v21 = vpack.c.bf16 %v498_v12, %v494_v11  ;;  %v902_v26 = vrot.slane %v888_v17, %v5001_v43  ;;  %v1064_v27 = vrot.slane %v1050_v18, %v5001_v43  ;;  %v512_v31 = vld [vmem:[%s4958_s26 + $0x168] sm:$0xff]  ;;  %v463_v39 = vld [vmem:[%s4974_s20 + $0x20] sm:$0xff]  ;;  %v464_v40 = vld [vmem:[%s4974_s20 + $0x28] sm:$0xff] }
  0x76   : > { %812 = vmatmul.mubr.f32.vlgmr.msra.gmra.mrb[0].mxu1 %v733_v50  ;;  %4288 = vmatprep.subr.bf16.mxu0 %v4287_v63  ;;  %v4301_v34 = vpack.c.bf16 %v497_v25, %v493_v24  ;;  %v4311_v38 = vpack.c.bf16 %v512_v31, %v508_v30  ;;  %v499_v41 = vld [vmem:[%s4958_s26 + $0x100] sm:$0xff]  ;;  %v1219_v46 = vrot.slane %v463_v39, %v5001_v43  ;;  %v502_v48 = vld [vmem:[%s4958_s26 + $0x118] sm:$0xff]  ;;  %v505_v61 = vld [vmem:[%s4958_s26 + $0x130] sm:$0xff] }
  0x77   : > { %4286 = vmatpush1.bf16.xpose.msra.mxu1 %v4285_v60  ;;  %881 = vmatprep.mubr.f32.mxu1 %v742_v62  ;;  %v904_v35 = vcombine.high %v902_v26, %v902_v26  ;;  %v1066_v36 = vcombine.high %v1064_v27, %v1064_v27  ;;  %v503_v42 = vld [vmem:[%s4958_s26 + $0x120] sm:$0xff]  ;;  %v1381_v47 = vrot.slane %v464_v40, %v5001_v43  ;;  %v506_v49 = vld [vmem:[%s4958_s26 + $0x138] sm:$0xff]  ;;  %v501_v60 = vld [vmem:[%s4958_s26 + $0x110] sm:$0xff] }
  0x78   : > { %4296 = vmatprep.subr.bf16.mxu1 %v4295_v0  ;;  %v507_v44 = vld [vmem:[%s4958_s26 + $0x140] sm:$0xff]  ;;  %v510_v50 = vld [vmem:[%s4958_s26 + $0x158] sm:$0xff]  ;;  %v1227_v54 = vcombine.high %v1219_v46, %v1219_v46  ;;  %v1212_v56 = vcombine.high %v463_v39, %v463_v39  ;;  %v1374_v57 = vcombine.high %v464_v40, %v464_v40  ;;  %v4307_v58 = vpack.c.bf16 %v506_v49, %v502_v48  ;;  %v509_v62 = vld [vmem:[%s4958_s26 + $0x150] sm:$0xff] }
  0x79   : > { %v511_v45 = vld [vmem:[%s4958_s26 + $0x160] sm:$0xff]  ;;  %v1389_v55 = vcombine.high %v1381_v47, %v1381_v47  ;;  %v513_v63 = vld [vmem:[%s4958_s26 + $0x170] sm:$0xff]  ;;  %v516_v2 = vld [vmem:[%s4958_s26 + $0x188] sm:$0xff]  ;;  %v4309_v6 = vpack.c.bf16 %v505_v61, %v501_v60  ;;  %v5096_v48 = vsub.s32 4, %v4993_v32 }
  0x7a   : > { %v4313_v53 = vpack.c.bf16 %v511_v45, %v507_v44  ;;  %v1226_v0 = vrot.slane %v1212_v56, %v5001_v43  ;;  %v1388_v1 = vrot.slane %v1374_v57, %v5001_v43  ;;  %v520_v3 = vld [vmem:[%s4958_s26 + $0x1a8] sm:$0xff]  ;;  %v527_v17 = vld [vmem:[%s4958_s26 + $0x1e0] sm:$0xff]  ;;  %v522_v22 = vld [vmem:[%s4958_s26 + $0x1b8] sm:$0xff] }
  0x7b   : > { %v524_v4 = vld [vmem:[%s4958_s26 + $0x1c8] sm:$0xff]  ;;  %v4319_v10 = vpack.c.bf16 %v520_v3, %v516_v2  ;;  %v526_v23 = vld [vmem:[%s4958_s26 + $0x1d8] sm:$0xff]  ;;  %v5108_v60 = vld [vmem:[%s4979_s24 + $0x18] sm:$0xff] }
  0x7c   : > { %720 = vmatmul.mubr.f32.vlgmr.msra.gmra.mrb[0].mxu0 %v578_v51  ;;  %v514_v51 = vld [vmem:[%s4958_s26 + $0x178] sm:$0xff]  ;;  %v528_v5 = vld [vmem:[%s4958_s26 + $0x1e8] sm:$0xff]  ;;  %v1390_v9 = vcombine.high %v1388_v1, %v1388_v1 }
  0x7d   : > { %4290 = vmatpush1.bf16.xpose.msra.mxu0 %v4289_v13  ;;  %973 = vmatprep.mubr.f32.mxu0 %v903_v15  ;;  %v4315_v59 = vpack.c.bf16 %v514_v51, %v510_v50  ;;  %v4327_v11 = vpack.c.bf16 %v528_v5, %v524_v4  ;;  %v465_v12 = vld [vmem:[%s4974_s20 + $0x30] sm:$0xff]  ;;  %v466_v13 = vld [vmem:[%s4974_s20 + $0x38] sm:$0xff]  ;;  %v519_v15 = vld [vmem:[%s4958_s26 + $0x1a0] sm:$0xff] }
  0x7e   : > { %882 = vmatmul.mubr.f32.vlgmr.msra.gmra.mrb[0].mxu1 %v740_v52  ;;  %4292 = vmatprep.subr.bf16.mxu0 %v4291_v19  ;;  %v4305_v52 = vpack.c.bf16 %v503_v42, %v499_v41  ;;  %v1543_v18 = vrot.slane %v465_v12, %v5001_v43  ;;  %v1705_v19 = vrot.slane %v466_v13, %v5001_v43  ;;  %v530_v24 = vld [vmem:[%s4958_s26 + $0x1f8] sm:$0xff] }
  0x7f   : > { %4298 = vmatpush1.bf16.xpose.msra.mxu1 %v4297_v14  ;;  %1135 = vmatprep.mubr.f32.mxu1 %v1065_v16  ;;  %v515_v14 = vld [vmem:[%s4958_s26 + $0x180] sm:$0xff]  ;;  %v1536_v29 = vcombine.high %v465_v12, %v465_v12  ;;  %v1698_v30 = vcombine.high %v466_v13, %v466_v13  ;;  %v5078_v45 = vld [vmem:[%s4979_s24] sm:$0xff] }
  0x80   : > { %4300 = vmatprep.subr.bf16.mxu1 %v4299_v21  ;;  %v523_v16 = vld [vmem:[%s4958_s26 + $0x1c0] sm:$0xff]  ;;  %v518_v21 = vld [vmem:[%s4958_s26 + $0x198] sm:$0xff]  ;;  %v4321_v25 = vpack.c.bf16 %v519_v15, %v515_v14  ;;  %v1713_v28 = vcombine.high %v1705_v19, %v1705_v19  ;;  %v534_v49 = vrot.slane %v5078_v45, %v5096_v48 }
  0x81   : > { %v4323_v31 = vpack.c.bf16 %v522_v22, %v518_v21  ;;  %v1712_v39 = vrot.slane %v1698_v30, %v5001_v43  ;;  %v5152_v21 = vld [vmem:[%s4979_s24 + $0x38] sm:$0xff] }
  0x83   : > { %v1714_v44 = vcombine.high %v1712_v39, %v1712_v39 }
  0x84   : > { %974 = vmatmul.mubr.f32.vlgmr.msra.gmra.mrb[2].mxu0 %v895_v7  ;;  %v4317_v7 = vpack.c.bf16 %v513_v63, %v509_v62  ;;  %v546_v62 = vrot.slane %v5108_v60, %v5096_v48 }
  0x85   : > { %4294 = vmatpush1.bf16.xpose.msra.mxu0 %v4293_v33  ;;  %1043 = vmatprep.mubr.f32.mxu0 %v904_v35  ;;  %v4331_v33 = vpack.c.bf16 %v530_v24, %v526_v23  ;;  %v521_v35 = vld [vmem:[%s4958_s26 + $0x1b0] sm:$0xff]  ;;  %v562_v23 = vrot.slane %v5152_v21, %v5096_v48 }
  0x86   : > { %1136 = vmatmul.mubr.f32.vlgmr.msra.gmra.mrb[2].mxu1 %v1057_v8  ;;  %4304 = vmatprep.subr.bf16.mxu0 %v4303_v37  ;;  %v1228_v8 = vcombine.high %v1226_v0, %v1226_v0  ;;  %v529_v37 = vld [vmem:[%s4958_s26 + $0x1f0] sm:$0xff] }
  0x87   : > { %4302 = vmatpush1.bf16.xpose.msra.mxu1 %v4301_v34  ;;  %1205 = vmatprep.mubr.f32.mxu1 %v1066_v36  ;;  %v517_v34 = vld [vmem:[%s4958_s26 + $0x190] sm:$0xff] }
  0x88   : > { %4312 = vmatprep.subr.bf16.mxu1 %v4311_v38  ;;  %v525_v36 = vld [vmem:[%s4958_s26 + $0x1d0] sm:$0xff]  ;;  %v1550_v38 = vrot.slane %v1536_v29, %v5001_v43  ;;  %v4325_v40 = vpack.c.bf16 %v521_v35, %v517_v34  ;;  %v4768_v34 = vmov 1   ;;  %v5173_v35 = vsub.s32 5, %v4993_v32 }
  0x89   : > { %v4333_v41 = vpack.c.bf16 %v529_v37, %v525_v36  ;;  %4599 = vset.pattern.permute.xlu0 %v4768_v34 }
  0x8a   : > { %v1552_v42 = vcombine.high %v1550_v38, %v1550_v38  ;;  %v1870_v36 = vrot.slane %v5078_v45, %v5173_v35 }
  0x8c   : > { %1044 = vmatmul.mubr.f32.vlgmr.msra.gmra.mrb[2].mxu0 %v902_v26  ;;  %v4329_v26 = vpack.c.bf16 %v527_v17, %v523_v16 }
  0x8d   : > { %4306 = vmatpush1.bf16.xpose.msra.mxu0 %v4305_v52  ;;  %1297 = vmatprep.mubr.f32.mxu0 %v1227_v54 }
  0x8e   : > { %1206 = vmatmul.mubr.f32.vlgmr.msra.gmra.mrb[2].mxu1 %v1064_v27  ;;  %4308 = vmatprep.subr.bf16.mxu0 %v4307_v58  ;;  %v1551_v27 = vcombine.high %v1543_v18, %v1543_v18 }
  0x8f   : > { %4314 = vmatpush1.bf16.xpose.msra.mxu1 %v4313_v53  ;;  %1459 = vmatprep.mubr.f32.mxu1 %v1389_v55 }
  0x90   : > { %4316 = vmatprep.subr.bf16.mxu1 %v4315_v59  ;;  %v5105_v59 = vld [vmem:[%s4979_s24 + $0x10] sm:$0xff] }
  0x91   : > { %v542_v61 = vrot.slane %v5105_v59, %v5096_v48 }
  0x94   : > { %1298 = vmatmul.mubr.f32.vlgmr.msra.gmra.mrb[4].mxu0 %v1219_v46  ;;  %v5081_v46 = vld [vmem:[%s4979_s24 + $0x8] sm:$0xff] }
  0x95   : > { %4310 = vmatpush1.bf16.xpose.msra.mxu0 %v4309_v6  ;;  %1367 = vmatprep.mubr.f32.mxu0 %v1228_v8  ;;  %v538_v50 = vrot.slane %v5081_v46, %v5096_v48  ;;  %v5130_v8 = vld [vmem:[%s4979_s24 + $0x28] sm:$0xff]  ;;  %v1874_v37 = vrot.slane %v5081_v46, %v5173_v35 }
  0x96   : > { %1460 = vmatmul.mubr.f32.vlgmr.msra.gmra.mrb[4].mxu1 %v1381_v47  ;;  %4320 = vmatprep.subr.bf16.mxu0 %v4319_v10  ;;  %v4765_v47 = vmov 0.0   ;;  %v554_v10 = vrot.slane %v5130_v8, %v5096_v48 }
  0x97   : > { %4318 = vmatpush1.bf16.xpose.msra.mxu1 %v4317_v7  ;;  %1529 = vmatprep.mubr.f32.mxu1 %v1390_v9  ;;  %v5127_v7 = vld [vmem:[%s4979_s24 + $0x20] sm:$0xff] }
  0x98   : > { %4328 = vmatprep.subr.bf16.mxu1 %v4327_v11  ;;  %v550_v9 = vrot.slane %v5127_v7, %v5096_v48 }
  0x9c   : > { %1368 = vmatmul.mubr.f32.vlgmr.msra.gmra.mrb[4].mxu0 %v1226_v0 }
  0x9d   : > { %4322 = vmatpush1.bf16.xpose.msra.mxu0 %v4321_v25  ;;  %1621 = vmatprep.mubr.f32.mxu0 %v1551_v27 }
  0x9e   : > { %1530 = vmatmul.mubr.f32.vlgmr.msra.gmra.mrb[4].mxu1 %v1388_v1  ;;  %4324 = vmatprep.subr.bf16.mxu0 %v4323_v31 }
  0x9f   : > { %4330 = vmatpush1.bf16.xpose.msra.mxu1 %v4329_v26  ;;  %1783 = vmatprep.mubr.f32.mxu1 %v1713_v28 }
  0xa0   : > { %4332 = vmatprep.subr.bf16.mxu1 %v4331_v33  ;;  %v4767_v33 = vmov 0  }
  0xa1   : > { %4600 = vset.pattern.permute.xlu1 %v4767_v33 }
  0xa4   : > { %1622 = vmatmul.mubr.f32.vlgmr.msra.gmra.mrb[6].mxu0 %v1543_v18 }
  0xa5   : > { %4326 = vmatpush1.bf16.xpose.msra.mxu0 %v4325_v40  ;;  %1691 = vmatprep.mubr.f32.mxu0 %v1552_v42 }
  0xa6   : > { %1784 = vmatmul.mubr.f32.vlgmr.msra.gmra.mrb[6].mxu1 %v1705_v19  ;;  %4231 = vmatprep.subr.mxu0 %v4765_v47  ;;  %v5149_v19 = vld [vmem:[%s4979_s24 + $0x30] sm:$0xff] }
  0xa7   : > { %4334 = vmatpush1.bf16.xpose.msra.mxu1 %v4333_v41  ;;  %1853 = vmatprep.mubr.f32.mxu1 %v1714_v44  ;;  %v558_v22 = vrot.slane %v5149_v19, %v5096_v48 }
  0xa8   : > { %4236 = vmatprep.subr.mxu1 %v4765_v47 }
  0xac   : > { %1692 = vmatmul.mubr.f32.vlgmr.msra.gmra.mrb[6].mxu0 %v1550_v38 }
  0xad   : > { %4232 = vmatpush3.xpose.msk.msra.mxu0 %vm1899_vm0, %v5078_v45  ;;  %4233 = vmatprep.mubr.msk.f32.mxu0 %vm4766_vm1, %v4765_v47  ;;  %v1878_v45 = vrot.slane %v5105_v59, %v5173_v35 }
  0xae   : > { %1854 = vmatmul.mubr.f32.vlgmr.msra.gmra.mrb[6].mxu1 %v1712_v39  ;;  %4241 = vmatprep.subr.mxu0 %v4765_v47 }
  0xaf   : > { %4237 = vmatpush3.xpose.msk.msra.mxu1 %vm1899_vm0, %v5081_v46  ;;  %4238 = vmatprep.mubr.msk.f32.mxu1 %vm4766_vm1, %v4765_v47  ;;  %v1882_v46 = vrot.slane %v5108_v60, %v5173_v35 }
  0xb0   : > { %4246 = vmatprep.subr.mxu1 %v4765_v47 }
 0x14f   : > { %v721_v51 = vpop.f32.mrb[0].mxu0 }
 0x150   : > { %v4495_v53 = vadd.f32 %v721_v51, %v534_v49  ;;  %v723_v55 = vpop.f32.mrb[1].mxu0 }
 0x151   : > { %v883_v52 = vpop.f32.mrb[0].mxu1 }
 0x152   : > { %v4496_v54 = vadd.f32 %v883_v52, %v538_v50  ;;  %v885_v56 = vpop.f32.mrb[1].mxu1  ;;  %v1859_v57 = vmax.f32 %v4495_v53, 0.0  ;;  %v4769_v50 = vmov 2  }
 0x153   : > { %v4770_v56 = vmov 3  }
 0x154   : > { %v1860_v58 = vmax.f32 %v4496_v54, 0.0  ;;  %4234 = vmatmul.mubr.msk.f32.vlgmr.msra.gmra.mrb[8].mxu0 %vm1899_vm0, %v1859_v57 }
 0x155   : > { %4242 = vmatpush3.xpose.msk.msra.mxu0 %vm1899_vm0, %v5105_v59  ;;  %4243 = vmatprep.mubr.msk.f32.mxu0 %vm4766_vm1, %v4765_v47 }
 0x156   : > { %4239 = vmatmul.mubr.msk.f32.vlgmr.msra.gmra.mrb[8].mxu1 %vm1899_vm0, %v1860_v58  ;;  %4251 = vmatprep.subr.mxu0 %v4765_v47 }
 0x157   : > { %4247 = vmatpush3.xpose.msk.msra.mxu1 %vm1899_vm0, %v5108_v60  ;;  %4248 = vmatprep.mubr.msk.f32.mxu1 %vm4766_vm1, %v4765_v47  ;;  %v1886_v60 = vrot.slane %v5127_v7, %v5173_v35 }
 0x158   : > { %4256 = vmatprep.subr.mxu1 %v4765_v47 }
 0x15f   : > { %v1045_v63 = vpop.f32.mrb[2].mxu0 }
 0x160   : > { %v4497_v1 = vadd.f32 %v1045_v63, %v542_v61  ;;  %v1047_v3 = vpop.f32.mrb[3].mxu0 }
 0x161   : > { %v1207_v0 = vpop.f32.mrb[2].mxu1 }
 0x162   : > { %v4498_v2 = vadd.f32 %v1207_v0, %v546_v62  ;;  %v1209_v4 = vpop.f32.mrb[3].mxu1  ;;  %v1861_v5 = vmax.f32 %v4497_v1, 0.0 }
 0x164   : > { %v1862_v6 = vmax.f32 %v4498_v2, 0.0  ;;  %4244 = vmatmul.mubr.msk.f32.vlgmr.msra.gmra.mrb[10].mxu0 %vm1899_vm0, %v1861_v5  ;;  %v1890_v2 = vrot.slane %v5130_v8, %v5173_v35 }
 0x165   : > { %4252 = vmatpush3.xpose.msk.msra.mxu0 %vm1899_vm0, %v5127_v7  ;;  %4253 = vmatprep.mubr.msk.f32.mxu0 %vm4766_vm1, %v4765_v47 }
 0x166   : > { %4249 = vmatmul.mubr.msk.f32.vlgmr.msra.gmra.mrb[10].mxu1 %vm1899_vm0, %v1862_v6  ;;  %4261 = vmatprep.subr.mxu0 %v4765_v47  ;;  %v1894_v6 = vrot.slane %v5149_v19, %v5173_v35 }
 0x167   : > { %4257 = vmatpush3.xpose.msk.msra.mxu1 %vm1899_vm0, %v5130_v8  ;;  %4258 = vmatprep.mubr.msk.f32.mxu1 %vm4766_vm1, %v4765_v47 }
 0x168   : > { %4266 = vmatprep.subr.mxu1 %v4765_v47 }
 0x16f   : > { %v1369_v11 = vpop.f32.mrb[4].mxu0 }
 0x170   : > { %v4499_v13 = vadd.f32 %v1369_v11, %v550_v9  ;;  %v1371_v15 = vpop.f32.mrb[5].mxu0  ;;  %v1898_v9 = vrot.slane %v5152_v21, %v5173_v35  ;;  %v2558_v35 = vand.u32 127, %v531_v20 }
 0x171   : > { %v1531_v12 = vpop.f32.mrb[4].mxu1 }
 0x172   : > { %v4500_v14 = vadd.f32 %v1531_v12, %v554_v10  ;;  %v1533_v16 = vpop.f32.mrb[5].mxu1  ;;  %v1863_v17 = vmax.f32 %v4499_v13, 0.0 }
 0x173   : > { %v4152_v16 = vld [vmem:[%s4964_s18 + $0x28] sm:$0xff] }
 0x174   : > { %v1864_v18 = vmax.f32 %v4500_v14, 0.0  ;;  %4254 = vmatmul.mubr.msk.f32.vlgmr.msra.gmra.mrb[12].mxu0 %vm1899_vm0, %v1863_v17  ;;  %v4154_v17 = vld [vmem:[%s4964_s18 + $0x38] sm:$0xff] }
 0x175   : > { %4262 = vmatpush3.xpose.msk.msra.mxu0 %vm1899_vm0, %v5149_v19  ;;  %4263 = vmatprep.mubr.msk.f32.mxu0 %vm4766_vm1, %v4765_v47  ;;  %v4153_v19 = vld [vmem:[%s4964_s18 + $0x30] sm:$0xff] }
 0x176   : > { %4259 = vmatmul.mubr.msk.f32.vlgmr.msra.gmra.mrb[12].mxu1 %vm1899_vm0, %v1864_v18  ;;  %v4151_v18 = vld [vmem:[%s4964_s18 + $0x20] sm:$0xff]  ;;  %2642 = vmatprep.subr.mxu0 %v4152_v16 }
 0x177   : > { %4267 = vmatpush3.xpose.msk.msra.mxu1 %vm1899_vm0, %v5152_v21  ;;  %4268 = vmatprep.mubr.msk.f32.mxu1 %vm4766_vm1, %v4765_v47 }
 0x178   : > { %2713 = vmatprep.subr.mxu1 %v4154_v17 }
 0x17f   : > { %v1693_v24 = vpop.f32.mrb[6].mxu0 }
 0x180   : > { %v4501_v26 = vadd.f32 %v1693_v24, %v558_v22  ;;  %v1695_v28 = vpop.f32.mrb[7].mxu0 }
 0x181   : > { %v1855_v25 = vpop.f32.mrb[6].mxu1 }
 0x182   : > { %v4502_v27 = vadd.f32 %v1855_v25, %v562_v23  ;;  %v1857_v29 = vpop.f32.mrb[7].mxu1  ;;  %v1865_v30 = vmax.f32 %v4501_v26, 0.0 }
 0x184   : > { %v1866_v31 = vmax.f32 %v4502_v27, 0.0  ;;  %4264 = vmatmul.mubr.msk.f32.vlgmr.msra.gmra.mrb[14].mxu0 %vm1899_vm0, %v1865_v30 }
 0x185   : > { %2706 = vmatprep.mubr.f32.mxu0 %v4765_v47  ;;  %2643 = vmatpush1.msra.mxu0 %v4151_v18 }
 0x186   : > { %4269 = vmatmul.mubr.msk.f32.vlgmr.msra.gmra.mrb[14].mxu1 %vm1899_vm0, %v1866_v31 }
 0x187   : > { %2777 = vmatprep.mubr.f32.mxu1 %v4765_v47  ;;  %2714 = vmatpush1.msra.mxu1 %v4153_v19 }
 0x227   : > { %v1972_v38 = vpop.f32.mrb[8].mxu0 }
 0x228   : > { %v1973_v40 = vadd.f32 %v1972_v38, %v1870_v36  ;;  %v4235_v42 = vpop.f32.mrb[9].mxu0  ;;  %v5243_v38 = vsub.s32 %v2558_v35, %v4993_v32 }
 0x229   : > { %v2048_v39 = vpop.f32.mrb[8].mxu1 }
 0x22a   : > { %v2049_v41 = vadd.f32 %v2048_v39, %v1874_v37  ;;  %v4240_v44 = vpop.f32.mrb[9].mxu1  ;;  %v5179_v48 = vmax.f32 %v1973_v40, 0.0 }
 0x22c   : > { %v5181_v49 = vmax.f32 %v2049_v41, 0.0  ;;  %2534 = vperm.xlu0 %4599, %v5179_v48  }
 0x22e   : > { %2788 = vperm.xlu1 %4600, %v5181_v49  }
 0x230   : > { %2537 = vperm.xlu0 %4599, %v5181_v49  }
 0x232   : > { %4601 = vset.pattern.permute.xlu1 %v4769_v50 }
 0x233   : > { %3031 = vperm.xlu1 %4601, %v5179_v48  }
 0x234   : > { %4602 = vset.pattern.permute.xlu0 %v4769_v50 }
 0x235   : > { %3034 = vperm.xlu0 %4602, %v5181_v49  }
 0x237   : > { %4604 = vset.pattern.permute.xlu1 %v4768_v34  ;;  %v2124_v51 = vpop.f32.mrb[10].mxu0 }
 0x238   : > { %v2125_v53 = vadd.f32 %v2124_v51, %v1878_v45  ;;  %v4245_v54 = vpop.f32.mrb[11].mxu0 }
 0x239   : > { %v2200_v52 = vpop.f32.mrb[10].mxu1  ;;  %4603 = vset.pattern.permute.xlu0 %v4770_v56 }
 0x23a   : > { %v4250_v55 = vpop.f32.mrb[11].mxu1  ;;  %v2510_v57 = vmax.f32 %v2125_v53, 0.0  ;;  %v2201_v58 = vadd.f32 %v2200_v52, %v1882_v46  ;;  %3281 = vperm.xlu0 %4603, %v5179_v48  }
 0x23c   : > { %2540 = vperm.xlu1 %4604, %v2510_v57   ;;  %v2511_v59 = vmax.f32 %v2201_v58, 0.0 }
 0x23e   : > { %4607 = vset.pattern.permute.xlu0 %v4768_v34 }
 0x240   : > { %2543 = vperm.xlu1 %4604, %v2511_v59  }
 0x244   : > { %4605 = vset.pattern.permute.xlu1 %v4767_v33 }
 0x245   : > { %2791 = vperm.xlu1 %4605, %v2510_v57  }
 0x247   : > { %v2276_v61 = vpop.f32.mrb[12].mxu0 }
 0x248   : > { %v2277_v63 = vadd.f32 %v2276_v61, %v1886_v60  ;;  %v4255_v0 = vpop.f32.mrb[13].mxu0 }
 0x249   : > { %v2352_v62 = vpop.f32.mrb[12].mxu1  ;;  %4606 = vset.pattern.permute.xlu1 %v4769_v50  ;;  %v2519_v0 = vld [vmem:[%s4964_s18 + $0x18] sm:$0xff] }
 0x24a   : > { %v4260_v1 = vpop.f32.mrb[13].mxu1  ;;  %v2512_v3 = vmax.f32 %v2277_v63, 0.0  ;;  %3037 = vperm.xlu1 %4606, %v2510_v57   ;;  %v2353_v4 = vadd.f32 %v2352_v62, %v1890_v2  ;;  %v2517_v63 = vld [vmem:[%s4964_s18 + $0x8] sm:$0xff]  ;;  %2954 = vmatprep.subr.mxu1 %v2519_v0  ;;  %v4161_v0 = vld [vmem:[%s4964_s18 + $0x50] sm:$0xff] }
 0x24b   : > { %2883 = vmatprep.subr.mxu0 %v2517_v63  ;;  %v4162_v63 = vld [vmem:[%s4964_s18 + $0x58] sm:$0xff] }
 0x24c   : > { %2546 = vperm.xlu0 %4607, %v2512_v3   ;;  %v2513_v5 = vmax.f32 %v2353_v4, 0.0 }
 0x24e   : > { %3040 = vperm.xlu1 %4606, %v2511_v59  }
 0x250   : > { %4610 = vset.pattern.permute.xlu0 %v4769_v50 }
 0x251   : > { %3043 = vperm.xlu0 %4610, %v2512_v3  }
 0x252   : > { %4608 = vset.pattern.permute.xlu1 %v4768_v34 }
 0x253   : > { %2549 = vperm.xlu1 %4608, %v2513_v5  }
 0x255   : > { %4612 = vset.pattern.permute.xlu0 %v4768_v34 }
 0x257   : > { %4609 = vset.pattern.permute.xlu1 %v4767_v33  ;;  %v2428_v8 = vpop.f32.mrb[14].mxu0 }
 0x258   : > { %v2429_v10 = vadd.f32 %v2428_v8, %v1894_v6  ;;  %2797 = vperm.xlu1 %4609, %v2512_v3   ;;  %v4265_v12 = vpop.f32.mrb[15].mxu0 }
 0x259   : > { %v2504_v7 = vpop.f32.mrb[14].mxu1 }
 0x25a   : > { %v4270_v11 = vpop.f32.mrb[15].mxu1  ;;  %v2514_v13 = vmax.f32 %v2429_v10, 0.0  ;;  %v2505_v14 = vadd.f32 %v2504_v7, %v1898_v9 }
 0x25c   : > { %4611 = vset.pattern.permute.xlu1 %v4769_v50  ;;  %2552 = vperm.xlu0 %4612, %v2514_v13   ;;  %v2515_v15 = vmax.f32 %v2505_v14, 0.0 }
 0x25d   : > { %3046 = vperm.xlu1 %4611, %v2513_v5  }
 0x260   : > { %4617 = vset.pattern.permute.xlu0 %v4770_v56 }
 0x261   : > { %4613 = vset.pattern.permute.xlu1 %v4768_v34  ;;  %3290 = vperm.xlu0 %4617, %v2511_v59  }
 0x262   : > { %2555 = vperm.xlu1 %4613, %v2515_v15  }
 0x265   : > { %4618 = vset.pattern.permute.xlu0 %v4767_v33 }
 0x266   : > { %4614 = vset.pattern.permute.xlu1 %v4770_v56  ;;  %2785 = vperm.xlu0 %4618, %v5179_v48  }
 0x267   : > { %3284 = vperm.xlu1 %4614, %v5181_v49  }
 0x26a   : > { %2794 = vperm.xlu0 %4618, %v2511_v59  }
 0x26b   : > { %4615 = vset.pattern.permute.xlu1 %v4767_v33 }
 0x26c   : > { %2803 = vperm.xlu1 %4615, %v2514_v13  }
 0x26e   : > { %2800 = vperm.xlu0 %4618, %v2513_v5  }
 0x270   : > { %4616 = vset.pattern.permute.xlu1 %v4770_v56 }
 0x271   : > { %3287 = vperm.xlu1 %4616, %v2510_v57  }
 0x272   : > { %2806 = vperm.xlu0 %4618, %v2515_v15  }
 0x275   : > { %4620 = vset.pattern.permute.xlu1 %v4769_v50 }
 0x276   : > { %3052 = vperm.xlu1 %4620, %v2515_v15   ;;  %4619 = vset.pattern.permute.xlu0 %v4769_v50 }
 0x277   : > { %3049 = vperm.xlu0 %4619, %v2514_v13  }
 0x27a   : > { %4621 = vset.pattern.permute.xlu1 %v4770_v56 }
 0x27b   : > { %3293 = vperm.xlu1 %4621, %v2512_v3   ;;  %4622 = vset.pattern.permute.xlu0 %v4770_v56 }
 0x27c   : > { %3296 = vperm.xlu0 %4622, %v2513_v5  }
 0x27f   : > { %3299 = vperm.xlu1 %4621, %v2514_v13  }
 0x280   : > { %3302 = vperm.xlu0 %4622, %v2515_v15  }
 0x2ab   : > { %v2535_v23 = vpop.permute.xlu0 %2534 }
 0x2ac   : > { %v2562_v42 = vrot.slane %v2535_v23, %v5243_v38 }
 0x2ad   : > { %v2789_v21 = vpop.permute.xlu1 %2788 }
 0x2ae   : > { %v2815_v60 = vrot.slane %v2789_v21, %v5243_v38 }
 0x2af   : > { %v2538_v26 = vpop.permute.xlu0 %2537 }
 0x2b0   : > { %v2566_v39 = vrot.slane %v2538_v26, %v5243_v38 }
 0x2b2   : > { %v5229_v22 = vpop.permute.xlu1 %3031  ;;  %v2592_v49 = vsel %vm2591_vm2, %v2566_v39, %v2562_v42 }
 0x2b3   : > { %v3057_v18 = vrot.slane %v5229_v22, %v5243_v38 }
 0x2b4   : > { %v5231_v28 = vpop.permute.xlu0 %3034 }
 0x2b5   : > { %v3061_v12 = vrot.slane %v5231_v28, %v5243_v38 }
 0x2b9   : > { %v5235_v30 = vpop.permute.xlu0 %3281 }
 0x2bb   : > { %v2541_v24 = vpop.permute.xlu1 %2540 }
 0x2bc   : > { %v2570_v40 = vrot.slane %v2541_v24, %v5243_v38 }
 0x2be   : > { %v2594_v45 = vsel %vm2593_vm3, %v2570_v40, %v2592_v49 }
 0x2bf   : > { %v2544_v25 = vpop.permute.xlu1 %2543 }
 0x2c0   : > { %v2574_v44 = vrot.slane %v2544_v25, %v5243_v38  ;;  %v3086_v25 = vsel %vm2591_vm2, %v3061_v12, %v3057_v18 }
 0x2c2   : > { %v2596_v51 = vsel %vm2595_vm4, %v2574_v44, %v2594_v45 }
 0x2c4   : > { %v2792_v27 = vpop.permute.xlu1 %2791 }
 0x2c5   : > { %v2819_v2 = vrot.slane %v2792_v27, %v5243_v38 }
 0x2c9   : > { %v5233_v29 = vpop.permute.xlu1 %3037 }
 0x2ca   : > { %v3065_v15 = vrot.slane %v5233_v29, %v5243_v38 }
 0x2cb   : > { %v2547_v33 = vpop.permute.xlu0 %2546 }
 0x2cc   : > { %v2578_v20 = vrot.slane %v2547_v33, %v5243_v38  ;;  %v3087_v22 = vsel %vm2593_vm3, %v3065_v15, %v3086_v25  ;;  %v3307_v33 = vrot.slane %v5235_v30, %v5243_v38  ;;  %v3658_v25 = vld [vmem:[#allocation7 + $0x208] sm:$0xff] (!%p4171_p3) }
 0x2cd   : > { %v5237_v31 = vpop.permute.xlu1 %3040 }
 0x2ce   : > { %v2598_v53 = vsel %vm2597_vm5, %v2578_v20, %v2596_v51  ;;  %v3069_v19 = vrot.slane %v5237_v31, %v5243_v38 }
 0x2d0   : > { %v5240_v36 = vpop.permute.xlu0 %3043 }
 0x2d1   : > { %v3073_v23 = vrot.slane %v5240_v36, %v5243_v38 }
 0x2d2   : > { %v2550_v34 = vpop.permute.xlu1 %2549 }
 0x2d3   : > { %v2582_v50 = vrot.slane %v2550_v34, %v5243_v38  ;;  %v3088_v34 = vsel %vm2595_vm4, %v3069_v19, %v3087_v22  ;;  %v3596_v19 = vld [vmem:[#allocation7 + $0x18] sm:$0xff] (!%p4171_p3)  ;;  %v3657_v22 = vld [vmem:[#allocation7 + $0x200] sm:$0xff] (!%p4171_p3) }
 0x2d4   : > { %v3089_v36 = vsel %vm2597_vm5, %v3073_v23, %v3088_v34  ;;  %v3600_v34 = vld [vmem:[#allocation7 + $0x38] sm:$0xff] (!%p4171_p3) }
 0x2d5   : > { %v2600_v55 = vsel %vm2599_vm6, %v2582_v50, %v2598_v53 }
 0x2d7   : > { %v2798_v37 = vpop.permute.xlu1 %2797 }
 0x2d8   : > { %v2827_v8 = vrot.slane %v2798_v37, %v5243_v38 }
 0x2db   : > { %v2553_v41 = vpop.permute.xlu0 %2552 }
 0x2dc   : > { %v5249_v48 = vpop.permute.xlu1 %3046  ;;  %v2586_v46 = vrot.slane %v2553_v41, %v5243_v38 }
 0x2dd   : > { %v3077_v26 = vrot.slane %v5249_v48, %v5243_v38 }
 0x2de   : > { %v2602_v57 = vsel %vm2601_vm7, %v2586_v46, %v2600_v55 }
 0x2df   : > { %v3090_v39 = vsel %vm2599_vm6, %v3077_v26, %v3089_v36  ;;  %v3660_v26 = vld [vmem:[#allocation7 + $0x218] sm:$0xff] (!%p4171_p3)  ;;  %v3599_v36 = vld [vmem:[#allocation7 + $0x30] sm:$0xff] (!%p4171_p3) }
 0x2e0   : > { %v5257_v52 = vpop.permute.xlu0 %3290 }
 0x2e1   : > { %v2556_v54 = vpop.permute.xlu1 %2555  ;;  %v3319_v30 = vrot.slane %v5257_v52, %v5243_v38 }
 0x2e2   : > { %v2590_v56 = vrot.slane %v2556_v54, %v5243_v38 }
 0x2e4   : > { %v2604_v58 = vsel %vm2603_vm8, %v2590_v56, %v2602_v57 }
 0x2e5   : > { %2606 = vxpose.xlu1.b32.start.end [1/1] (short) (narrow) %v2604_v58, 8  ;;  %v2786_v59 = vpop.permute.xlu0 %2785 }
 0x2e6   : > { %v2811_v61 = vrot.slane %v2786_v59, %v5243_v38  ;;  %v3285_v62 = vpop.permute.xlu1 %3284  ;;  %v2516_v59 = vld [vmem:[%s4964_s18] sm:$0xff] }
 0x2e7   : > { %v3311_v27 = vrot.slane %v3285_v62, %v5243_v38  ;;  %v4160_v62 = vld [vmem:[%s4964_s18 + $0x48] sm:$0xff] }
 0x2e8   : > { %v2840_v1 = vsel %vm2591_vm2, %v2815_v60, %v2811_v61  ;;  %v2518_v60 = vld [vmem:[%s4964_s18 + $0x10] sm:$0xff] }
 0x2e9   : > { %v2795_v3 = vpop.permute.xlu0 %2794  ;;  %v2841_v5 = vsel %vm2593_vm3, %v2819_v2, %v2840_v1  ;;  %v3336_v40 = vsel %vm2591_vm2, %v3311_v27, %v3307_v33  ;;  %v4166_v2 = vld [vmem:[%s4964_s18 + $0x68] sm:$0xff] }
 0x2ea   : > { %v2823_v4 = vrot.slane %v2795_v3, %v5243_v38  ;;  %v4168_v3 = vld [vmem:[%s4964_s18 + $0x78] sm:$0xff] }
 0x2eb   : > { %v2804_v6 = vpop.permute.xlu1 %2803 }
 0x2ec   : > { %v2842_v7 = vsel %vm2595_vm4, %v2823_v4, %v2841_v5  ;;  %v2835_v16 = vrot.slane %v2804_v6, %v5243_v38  ;;  %v4165_v5 = vld [vmem:[%s4964_s18 + $0x60] sm:$0xff]  ;;  %v4167_v6 = vld [vmem:[%s4964_s18 + $0x70] sm:$0xff] }
 0x2ed   : > { %v2801_v9 = vpop.permute.xlu0 %2800  ;;  %v2843_v11 = vsel %vm2597_vm5, %v2827_v8, %v2842_v7 }
 0x2ee   : > { %v2831_v10 = vrot.slane %v2801_v9, %v5243_v38 }
 0x2f0   : > { %v2844_v13 = vsel %vm2599_vm6, %v2831_v10, %v2843_v11  ;;  %v3288_v14 = vpop.permute.xlu1 %3287 }
 0x2f1   : > { %v2807_v17 = vpop.permute.xlu0 %2806  ;;  %v2845_v24 = vsel %vm2601_vm7, %v2835_v16, %v2844_v13  ;;  %v3315_v29 = vrot.slane %v3288_v14, %v5243_v38  ;;  %v3525_v16 = vld [vmem:[#allocation2] sm:$0xff] }
 0x2f2   : > { %v2839_v21 = vrot.slane %v2807_v17, %v5243_v38 }
 0x2f3   : > { %v3337_v42 = vsel %vm2593_vm3, %v3315_v29, %v3336_v40  ;;  %v3659_v29 = vld [vmem:[#allocation7 + $0x210] sm:$0xff] (!%p4171_p3)  ;;  %v3662_v40 = vld [vmem:[#allocation7 + $0x228] sm:$0xff] (!%p4171_p3) }
 0x2f4   : > { %v2846_v28 = vsel %vm2603_vm8, %v2839_v21, %v2845_v24  ;;  %v3338_v45 = vsel %vm2595_vm4, %v3319_v30, %v3337_v42  ;;  %v3593_v21 = vld [vmem:[#allocation7] sm:$0xff] (!%p4171_p3)  ;;  %v3595_v24 = vld [vmem:[#allocation7 + $0x10] sm:$0xff] (!%p4171_p3)  ;;  %v4401_v33 = vpack.c.bf16 (!%p4171_p3), %v3659_v29, %v3657_v22  ;;  %v3620_v22 = vld [vmem:[#allocation7 + $0xd8] sm:$0xff] (!%p4171_p3) }
 0x2f5   : > { %v3053_v31 = vpop.permute.xlu1 %3052  ;;  %2848 = vxpose.xlu0.b32.start.end [1/1] (short) (narrow) %v2846_v28, 8  ;;  %v4337_v27 = vpack.c.bf16 (!%p4171_p3), %v3595_v24, %v3593_v21  ;;  %v4399_v28 = vpack.c.bf16 (!%p4171_p3), %v3660_v26, %v3658_v25  ;;  %v3661_v42 = vld [vmem:[#allocation7 + $0x220] sm:$0xff] (!%p4171_p3)  ;;  %v3663_v30 = vld [vmem:[#allocation7 + $0x230] sm:$0xff] (!%p4171_p3)  ;;  %v3682_v29 = vld [vmem:[#allocation7 + $0x2c8] sm:$0xff] (!%p4171_p3) }
 0x2f6   : > { %v3050_v35 = vpop.permute.xlu0 %3049  ;;  %v3085_v41 = vrot.slane %v3053_v31, %v5243_v38  ;;  %v3598_v31 = vld [vmem:[#allocation7 + $0x28] sm:$0xff] (!%p4171_p3)  ;;  %v3615_v24 = vld [vmem:[#allocation7 + $0xb0] sm:$0xff] (!%p4171_p3)  ;;  %v3677_v25 = vld [vmem:[#allocation7 + $0x2a0] sm:$0xff] (!%p4171_p3) }
 0x2f7   : > { %v3081_v37 = vrot.slane %v3050_v35, %v5243_v38  ;;  %v3597_v35 = vld [vmem:[#allocation7 + $0x20] sm:$0xff] (!%p4171_p3) }
 0x2f9   : > { %v3091_v44 = vsel %vm2601_vm7, %v3081_v37, %v3090_v39  ;;  %v4339_v37 = vpack.c.bf16 (!%p4171_p3), %v3600_v34, %v3598_v31  ;;  %v4341_v39 = vpack.c.bf16 (!%p4171_p3), %v3599_v36, %v3597_v35  ;;  %v3684_v31 = vld [vmem:[#allocation7 + $0x2d8] sm:$0xff] (!%p4171_p3)  ;;  %v3617_v36 = vld [vmem:[#allocation7 + $0xc0] sm:$0xff] (!%p4171_p3) }
 0x2fa   : > { %v3294_v48 = vpop.permute.xlu1 %3293  ;;  %v3092_v20 = vsel %vm2603_vm8, %v3085_v41, %v3091_v44  ;;  %v3664_v41 = vld [vmem:[#allocation7 + $0x238] sm:$0xff] (!%p4171_p3) }
 0x2fb   : > { %v3323_v49 = vrot.slane %v3294_v48, %v5243_v38  ;;  %3094 = vxpose.xlu0.b32.start.end [1/1] (short) (narrow) %v3092_v20, 8  ;;  %v3297_v50 = vpop.permute.xlu0 %3296  ;;  %v4403_v44 = vpack.c.bf16 (!%p4171_p3), %v3664_v41, %v3662_v40  ;;  %v3602_v48 = vld [vmem:[#allocation7 + $0x48] sm:$0xff] (!%p4171_p3)  ;;  %v3604_v20 = vld [vmem:[#allocation7 + $0x58] sm:$0xff] (!%p4171_p3)  ;;  %v4423_v40 = vpack.c.bf16 (!%p4171_p3), %v3684_v31, %v3682_v29  ;;  %v3683_v41 = vld [vmem:[#allocation7 + $0x2d0] sm:$0xff] (!%p4171_p3)  ;;  %v3559_v29 = vsub.s32 (!%p4171_p3), 0, %v4993_v32 }
 0x2fc   : > { %v3327_v46 = vrot.slane %v3297_v50, %v5243_v38  ;;  %v4343_v50 = vpack.c.bf16 (!%p4171_p3), %v3604_v20, %v3602_v48  ;;  %v3688_v48 = vld [vmem:[#allocation7 + $0x2f8] sm:$0xff] (!%p4171_p3) }
 0x2fd   : > { %v3339_v51 = vsel %vm2597_vm5, %v3323_v49, %v3338_v45  ;;  %v4405_v49 = vpack.c.bf16 (!%p4171_p3), %v3663_v30, %v3661_v42  ;;  %v3601_v45 = vld [vmem:[#allocation7 + $0x40] sm:$0xff] (!%p4171_p3)  ;;  %v3622_v42 = vld [vmem:[#allocation7 + $0xe8] sm:$0xff] (!%p4171_p3) }
 0x2fe   : > { %v3300_v53 = vpop.permute.xlu1 %3299  ;;  %v3340_v55 = vsel %vm2599_vm6, %v3327_v46, %v3339_v51  ;;  %v3603_v46 = vld [vmem:[#allocation7 + $0x50] sm:$0xff] (!%p4171_p3)  ;;  %v3666_v51 = vld [vmem:[#allocation7 + $0x248] sm:$0xff] (!%p4171_p3) }
 0x2ff   : > { %v3331_v52 = vrot.slane %v3300_v53, %v5243_v38  ;;  %v3303_v54 = vpop.permute.xlu0 %3302  ;;  %v3668_v53 = vld [vmem:[#allocation7 + $0x258] sm:$0xff] (!%p4171_p3)  ;;  %v3686_v30 = vld [vmem:[#allocation7 + $0x2e8] sm:$0xff] (!%p4171_p3) }
 0x300   : > { %v3335_v56 = vrot.slane %v3303_v54, %v5243_v38  ;;  %v4159_v38 = vld [vmem:[%s4964_s18 + $0x40] sm:$0xff]  ;;  %v3667_v54 = vld [vmem:[#allocation7 + $0x250] sm:$0xff] (!%p4171_p3) }
 0x301   : > { %v3341_v57 = vsel %vm2601_vm7, %v3331_v52, %v3340_v55  ;;  %v3665_v52 = vld [vmem:[#allocation7 + $0x240] sm:$0xff] (!%p4171_p3)  ;;  %v4345_v55 = vpack.c.bf16 (!%p4171_p3), %v3603_v46, %v3601_v45  ;;  %v3623_v46 = vld [vmem:[#allocation7 + $0xf0] sm:$0xff] (!%p4171_p3) }
 0x302   : > { %v3342_v58 = vsel %vm2603_vm8, %v3335_v56, %v3341_v57  ;;  %v4407_v56 = vpack.c.bf16 (!%p4171_p3), %v3668_v53, %v3666_v51  ;;  %v3606_v57 = vld [vmem:[#allocation7 + $0x68] sm:$0xff] (!%p4171_p3)  ;;  %v3621_v45 = vld [vmem:[#allocation7 + $0xe0] sm:$0xff] (!%p4171_p3)  ;;  %v4427_v53 = vpack.c.bf16 (!%p4171_p3), %v3688_v48, %v3686_v30  ;;  %v3644_v48 = vld [vmem:[#allocation7 + $0x198] sm:$0xff] (!%p4171_p3) }
 0x303   : > { %3344 = vxpose.xlu0.b32.start.end [1/1] (short) (narrow) %v3342_v58, 8  ;;  %v3608_v58 = vld [vmem:[#allocation7 + $0x78] sm:$0xff] (!%p4171_p3)  ;;  %v3685_v51 = vld [vmem:[#allocation7 + $0x2e0] sm:$0xff] (!%p4171_p3)  ;;  %v3642_v30 = vld [vmem:[#allocation7 + $0x188] sm:$0xff] (!%p4171_p3) }
 0x365   : > { %v2622_v61 = vpop.trf.xlu1 }
 0x366   : > { %4155 = vmatmul.mubr.msk.f32.vlgmr.msra.gmra.mrb[16].mxu0 %vm2638_vm9, %v2622_v61  ;;  %4156 = vmatmul.mubr.msk.f32.vlgmr.msra.gmra.mrb[16].mxu1 %vm2638_vm9, %v2622_v61  ;;  %v4347_v61 = vpack.c.bf16 (!%p4171_p3), %v3608_v58, %v3606_v57  ;;  %v3692_v57 = vld [vmem:[#allocation7 + $0x318] sm:$0xff] (!%p4171_p3)  ;;  %v4365_v58 = vpack.c.bf16 (!%p4171_p3), %v3623_v46, %v3621_v45 }
 0x367   : > { %2884 = vmatpush1.msra.mxu0 %v2516_v59  ;;  %2955 = vmatpush1.msra.mxu1 %v2518_v60  ;;  %v3605_v59 = vld [vmem:[#allocation7 + $0x60] sm:$0xff] (!%p4171_p3)  ;;  %v4409_v60 = vpack.c.bf16 (!%p4171_p3), %v3667_v54, %v3665_v52  ;;  %v3687_v52 = vld [vmem:[#allocation7 + $0x2f0] sm:$0xff] (!%p4171_p3)  ;;  %v3626_v54 = vld [vmem:[#allocation7 + $0x108] sm:$0xff] (!%p4171_p3) }
 0x368   : > { %2947 = vmatprep.mubr.f32.mxu0 %v4765_v47  ;;  %3018 = vmatprep.mubr.f32.mxu1 %v4765_v47  ;;  %v3555_v45 = vld [vmem:[%s5504_s4] sm:$0xf] (!%p4171_p3) }
 0x369   : > { %3129 = vmatprep.subr.mxu0 %v4160_v62  ;;  %3200 = vmatprep.subr.mxu1 %v4162_v63  ;;  %v3607_v62 = vld [vmem:[#allocation7 + $0x70] sm:$0xff] (!%p4171_p3)  ;;  %v3670_v63 = vld [vmem:[#allocation7 + $0x268] sm:$0xff] (!%p4171_p3)  ;;  %v3560_v46 = vrot.slane (!%p4171_p3), %v3555_v45, %v3559_v29 }
 0x375   : > { %v2864_v1 = vpop.trf.xlu0 }
 0x376   : > { %4157 = vmatmul.mubr.msk.f32.vlgmr.msra.gmra.mrb[16].mxu0 %vm2638_vm9, %v2864_v1  ;;  %4158 = vmatmul.mubr.msk.f32.vlgmr.msra.gmra.mrb[16].mxu1 %vm2638_vm9, %v2864_v1  ;;  %v3669_v1 = vld [vmem:[#allocation7 + $0x260] sm:$0xff] (!%p4171_p3) }
 0x377   : > { %3130 = vmatpush1.msra.mxu0 %v4159_v38  ;;  %3201 = vmatpush1.msra.mxu1 %v4161_v0  ;;  %v3672_v38 = vld [vmem:[#allocation7 + $0x278] sm:$0xff] (!%p4171_p3) }
 0x378   : > { %3193 = vmatprep.mubr.f32.mxu0 %v4765_v47  ;;  %3264 = vmatprep.mubr.f32.mxu1 %v4765_v47  ;;  %v4411_v0 = vpack.c.bf16 (!%p4171_p3), %v3672_v38, %v3670_v63  ;;  %v3689_v63 = vld [vmem:[#allocation7 + $0x300] sm:$0xff] (!%p4171_p3) }
 0x379   : > { %3379 = vmatprep.subr.mxu0 %v4166_v2  ;;  %3450 = vmatprep.subr.mxu1 %v4168_v3  ;;  %v3671_v2 = vld [vmem:[#allocation7 + $0x270] sm:$0xff] (!%p4171_p3)  ;;  %v3610_v3 = vld [vmem:[#allocation7 + $0x88] sm:$0xff] (!%p4171_p3) }
 0x37b   : > { %v3110_v4 = vpop.trf.xlu0 }
 0x37e   : > { %4163 = vmatmul.mubr.msk.f32.vlgmr.msra.gmra.mrb[16].mxu0 %vm2638_vm9, %v3110_v4  ;;  %4164 = vmatmul.mubr.msk.f32.vlgmr.msra.gmra.mrb[16].mxu1 %vm2638_vm9, %v3110_v4  ;;  %v3612_v4 = vld [vmem:[#allocation7 + $0x98] sm:$0xff] (!%p4171_p3) }
 0x37f   : > { %3380 = vmatpush1.msra.mxu0 %v4165_v5  ;;  %3451 = vmatpush1.msra.mxu1 %v4167_v6  ;;  %v4349_v5 = vpack.c.bf16 (!%p4171_p3), %v3607_v62, %v3605_v59  ;;  %v3674_v6 = vld [vmem:[#allocation7 + $0x288] sm:$0xff] (!%p4171_p3)  ;;  %v4429_v59 = vpack.c.bf16 (!%p4171_p3), %v3687_v52, %v3685_v51  ;;  %v3627_v62 = vld [vmem:[#allocation7 + $0x110] sm:$0xff] (!%p4171_p3) }
 0x380   : > { %3443 = vmatprep.mubr.f32.mxu0 %v4765_v47  ;;  %3514 = vmatprep.mubr.f32.mxu1 %v4765_v47  ;;  %v3594_v47 = vld [vmem:[#allocation7 + $0x8] sm:$0xff] (!%p4171_p3) }
 0x381   : > { %v4335_v23 = vpack.c.bf16 (!%p4171_p3), %v3596_v19, %v3594_v47  ;;  %4400 = vmatprep.subr.bf16.mxu0 (!%p4171_p3), %v4399_v28  ;;  %v3618_v28 = vld [vmem:[#allocation7 + $0xc8] sm:$0xff] (!%p4171_p3) }
 0x382   : > { %v4359_v35 = vpack.c.bf16 (!%p4171_p3), %v3620_v22, %v3618_v28  ;;  %v3702_v28 = vld [vmem:[#allocation7 + $0x368] sm:$0xff] (!%p4171_p3)  ;;  %v3704_v22 = vld [vmem:[#allocation7 + $0x378] sm:$0xff] (!%p4171_p3) }
 0x383   : > { %v3360_v7 = vpop.trf.xlu0  ;;  %4336 = vmatprep.subr.bf16.mxu1 (!%p4171_p3), %v4335_v23  ;;  %v3613_v23 = vld [vmem:[#allocation7 + $0xa0] sm:$0xff] (!%p4171_p3) }
 0x386   : > { %4169 = vmatmul.mubr.msk.f32.vlgmr.msra.gmra.mrb[16].mxu0 %vm2638_vm9, %v3360_v7  ;;  %4170 = vmatmul.mubr.msk.f32.vlgmr.msra.gmra.mrb[16].mxu1 %vm2638_vm9, %v3360_v7  ;;  %v3676_v7 = vld [vmem:[#allocation7 + $0x298] sm:$0xff] (!%p4171_p3) }
 0x387   : > { %4338 = vmatpush1.bf16.msra.mxu1 (!%p4171_p3), %v4337_v27  ;;  %4402 = vmatpush1.bf16.msra.mxu0 (!%p4171_p3), %v4401_v33  ;;  %v3679_v27 = vld [vmem:[#allocation7 + $0x2b0] sm:$0xff] (!%p4171_p3)  ;;  %v4357_v33 = vpack.c.bf16 (!%p4171_p3), %v3615_v24, %v3613_v23  ;;  %v3697_v23 = vld [vmem:[#allocation7 + $0x340] sm:$0xff] (!%p4171_p3) }
 0x388   : > { %4340 = vmatprep.subr.bf16.mxu1 (!%p4171_p3), %v4339_v37  ;;  %4404 = vmatprep.subr.bf16.mxu0 (!%p4171_p3), %v4403_v44  ;;  %v4421_v34 = vpack.c.bf16 (!%p4171_p3), %v3679_v27, %v3677_v25  ;;  %v3619_v37 = vld [vmem:[#allocation7 + $0xd0] sm:$0xff] (!%p4171_p3)  ;;  %v3624_v44 = vld [vmem:[#allocation7 + $0xf8] sm:$0xff] (!%p4171_p3) }
 0x389   : > { %v4361_v20 = vpack.c.bf16 (!%p4171_p3), %v3619_v37, %v3617_v36  ;;  %v3699_v25 = vld [vmem:[#allocation7 + $0x350] sm:$0xff] (!%p4171_p3)  ;;  %v3640_v27 = vld [vmem:[#allocation7 + $0x178] sm:$0xff] (!%p4171_p3)  ;;  %v3567_v36 = vsub.s32 (!%p4171_p3), 2, %v4993_v32  ;;  %v3571_v37 = vsub.s32 (!%p4171_p3), 3, %v4993_v32 }
 0x38b   : > { %4342 = vmatpush1.bf16.msra.mxu1 (!%p4171_p3), %v4341_v39  ;;  %4406 = vmatpush1.bf16.msra.mxu0 (!%p4171_p3), %v4405_v49  ;;  %v3681_v39 = vld [vmem:[#allocation7 + $0x2c0] sm:$0xff] (!%p4171_p3)  ;;  %v3572_v52 = vrot.slane (!%p4171_p3), %v3555_v45, %v3571_v37 }
 0x38c   : > { %4344 = vmatprep.subr.bf16.mxu1 (!%p4171_p3), %v4343_v50  ;;  %4408 = vmatprep.subr.bf16.mxu0 (!%p4171_p3), %v4407_v56  ;;  %v4425_v49 = vpack.c.bf16 (!%p4171_p3), %v3683_v41, %v3681_v39  ;;  %v4363_v50 = vpack.c.bf16 (!%p4171_p3), %v3624_v44, %v3622_v42  ;;  %v3690_v56 = vld [vmem:[#allocation7 + $0x308] sm:$0xff] (!%p4171_p3)  ;;  %v4441_v39 = vpack.c.bf16 (!%p4171_p3), %v3699_v25, %v3697_v23  ;;  %v3701_v41 = vld [vmem:[#allocation7 + $0x360] sm:$0xff] (!%p4171_p3)  ;;  %v3703_v44 = vld [vmem:[#allocation7 + $0x370] sm:$0xff] (!%p4171_p3) }
 0x38d   : > { %v4431_v38 = vpack.c.bf16 (!%p4171_p3), %v3692_v57, %v3690_v56  ;;  %v4443_v42 = vpack.c.bf16 (!%p4171_p3), %v3704_v22, %v3702_v28  ;;  %v3641_v56 = vld [vmem:[#allocation7 + $0x180] sm:$0xff] (!%p4171_p3)  ;;  %v3643_v57 = vld [vmem:[#allocation7 + $0x190] sm:$0xff] (!%p4171_p3)  ;;  %v3654_v28 = vld [vmem:[#allocation7 + $0x1e8] sm:$0xff] (!%p4171_p3) }
 0x38e   : > { %v3649_v23 = vld [vmem:[#allocation7 + $0x1c0] sm:$0xff] (!%p4171_p3)  ;;  %v3656_v22 = vld [vmem:[#allocation7 + $0x1f8] sm:$0xff] (!%p4171_p3) }
 0x38f   : > { %4346 = vmatpush1.bf16.msra.mxu1 (!%p4171_p3), %v4345_v55  ;;  %4410 = vmatpush1.bf16.msra.mxu0 (!%p4171_p3), %v4409_v60  ;;  %v3628_v55 = vld [vmem:[#allocation7 + $0x118] sm:$0xff] (!%p4171_p3)  ;;  %v3713_v25 = vld [vmem:[#allocation7 + $0x3c0] sm:$0xff] (!%p4171_p3) }
 0x390   : > { %4348 = vmatprep.subr.bf16.mxu1 (!%p4171_p3), %v4347_v61  ;;  %4412 = vmatprep.subr.bf16.mxu0 (!%p4171_p3), %v4411_v0  ;;  %v4367_v60 = vpack.c.bf16 (!%p4171_p3), %v3628_v55, %v3626_v54  ;;  %v3625_v61 = vld [vmem:[#allocation7 + $0x100] sm:$0xff] (!%p4171_p3)  ;;  %v3691_v0 = vld [vmem:[#allocation7 + $0x310] sm:$0xff] (!%p4171_p3)  ;;  %v4445_v54 = vpack.c.bf16 (!%p4171_p3), %v3703_v44, %v3701_v41  ;;  %v4383_v55 = vpack.c.bf16 (!%p4171_p3), %v3644_v48, %v3642_v30 }
 0x391   : > { %v4395_v41 = vpack.c.bf16 (!%p4171_p3), %v3656_v22, %v3654_v28  ;;  %v3655_v44 = vld [vmem:[#allocation7 + $0x1f0] sm:$0xff] (!%p4171_p3)  ;;  %v3717_v30 = vld [vmem:[#allocation7 + $0x3e0] sm:$0xff] (!%p4171_p3)  ;;  %v3929_v22 = vld [vmem:[%s5507_s7 + $0xf0] sm:$0xff] (!%p4171_p3) }
 0x393   : > { %4350 = vmatpush1.bf16.msra.mxu1 (!%p4171_p3), %v4349_v5  ;;  %v4369_v5 = vpack.c.bf16 (!%p4171_p3), %v3627_v62, %v3625_v61  ;;  %v3646_v61 = vld [vmem:[#allocation7 + $0x1a8] sm:$0xff] (!%p4171_p3)  ;;  %v3648_v62 = vld [vmem:[#allocation7 + $0x1b8] sm:$0xff] (!%p4171_p3) }
 0x459   : > { %v3445_v8 = vpop.f32.mrb[16].mxu0  ;;  %v3516_v9 = vpop.f32.mrb[16].mxu1 }
 0x45a   : > { %v3447_v10 = vpop.f32.mrb[17].mxu0  ;;  %v3518_v11 = vpop.f32.mrb[17].mxu1 }
 0x45b   : > { %v3530_v12 = vcombine.low %v3445_v8, %v3447_v10  ;;  %v3531_v13 = vcombine.low %v3516_v9, %v3518_v11  ;;  %v4413_v8 = vpack.c.bf16 (!%p4171_p3), %v3671_v2, %v3669_v1  ;;  %v4351_v9 = vpack.c.bf16 (!%p4171_p3), %v3612_v4, %v3610_v3  ;;  %v3609_v10 = vld [vmem:[#allocation7 + $0x80] sm:$0xff] (!%p4171_p3)  ;;  %v3611_v11 = vld [vmem:[#allocation7 + $0x90] sm:$0xff] (!%p4171_p3)  ;;  %v3630_v1 = vld [vmem:[#allocation7 + $0x128] sm:$0xff] (!%p4171_p3) }
 0x45c   : > { %v4353_v47 = vpack.c.bf16 (!%p4171_p3), %v3611_v11, %v3609_v10  ;;  %v3632_v2 = vld [vmem:[#allocation7 + $0x138] sm:$0xff] (!%p4171_p3)  ;;  %v3694_v3 = vld [vmem:[#allocation7 + $0x328] sm:$0xff] (!%p4171_p3)  ;;  %v3693_v10 = vld [vmem:[#allocation7 + $0x320] sm:$0xff] (!%p4171_p3) }
 0x45d   : > { %v3538_v14 = vrot.slane %v3530_v12, %v5001_v43  ;;  %v3545_v15 = vrot.slane %v3531_v13, %v5001_v43  ;;  %3553 = sbr.rel (%p4171_p3) target bundleno = 1608 (0x648), region = 91  ;;  %v3673_v12 = vld [vmem:[#allocation7 + $0x280] sm:$0xff] (!%p4171_p3)  ;;  %v4415_v13 = vpack.c.bf16 (!%p4171_p3), %v3676_v7, %v3674_v6  ;;  %4414 = vmatpush1.bf16.msra.mxu0 (!%p4171_p3), %v4413_v8  ;;  %4352 = vmatprep.subr.bf16.mxu1 (!%p4171_p3), %v4351_v9  ;;  %v3696_v4 = vld [vmem:[#allocation7 + $0x338] sm:$0xff] (!%p4171_p3)  ;;  %v3631_v9 = vld [vmem:[#allocation7 + $0x130] sm:$0xff] (!%p4171_p3) }
 0x45e   : > { %4354 = vmatpush1.bf16.msra.mxu1 (!%p4171_p3), %v4353_v47  ;;  %v4433_v6 = vpack.c.bf16 (!%p4171_p3), %v3691_v0, %v3689_v63  ;;  %v4371_v7 = vpack.c.bf16 (!%p4171_p3), %v3632_v2, %v3630_v1  ;;  %v3629_v8 = vld [vmem:[#allocation7 + $0x120] sm:$0xff] (!%p4171_p3)  ;;  %v4435_v11 = vpack.c.bf16 (!%p4171_p3), %v3696_v4, %v3694_v3  ;;  %v3710_v0 = vld [vmem:[#allocation7 + $0x3a8] sm:$0xff] (!%p4171_p3)  ;;  %v3712_v1 = vld [vmem:[#allocation7 + $0x3b8] sm:$0xff] (!%p4171_p3)  ;;  %v4385_v2 = vpack.c.bf16 (!%p4171_p3), %v3643_v57, %v3641_v56 }
 0x45f   : > { %v3546_v17 = vcombine.low %v3538_v14, %v3545_v15  ;;  %v3675_v14 = vld [vmem:[#allocation7 + $0x290] sm:$0xff] (!%p4171_p3)  ;;  %v3614_v15 = vld [vmem:[#allocation7 + $0xa8] sm:$0xff] (!%p4171_p3)  ;;  %4416 = vmatprep.subr.bf16.mxu0 (!%p4171_p3), %v4415_v13  ;;  %v3645_v3 = vld [vmem:[#allocation7 + $0x1a0] sm:$0xff] (!%p4171_p3) }
 0x460   : > { %v4417_v19 = vpack.c.bf16 (!%p4171_p3), %v3675_v14, %v3673_v12  ;;  %v3695_v12 = vld [vmem:[#allocation7 + $0x330] sm:$0xff] (!%p4171_p3)  ;;  %v3634_v13 = vld [vmem:[#allocation7 + $0x148] sm:$0xff] (!%p4171_p3)  ;;  %v3636_v14 = vld [vmem:[#allocation7 + $0x158] sm:$0xff] (!%p4171_p3) }
 0x461   : > { %v3548_v18 = vadd.f32 %v3546_v17, %v3525_v16  ;;  %v3616_v16 = vld [vmem:[#allocation7 + $0xb8] sm:$0xff] (!%p4171_p3)  ;;  %v3678_v17 = vld [vmem:[#allocation7 + $0x2a8] sm:$0xff] (!%p4171_p3)  ;;  %v4375_v47 = vpack.c.bf16 (!%p4171_p3), %v3636_v14, %v3634_v13  ;;  %v3918_v57 = vld [vmem:[%s5507_s7 + $0x98] sm:$0xff] (!%p4171_p3) }
 0x462   : > { %v4355_v21 = vpack.c.bf16 (!%p4171_p3), %v3616_v16, %v3614_v15  ;;  %4418 = vmatpush1.bf16.msra.mxu0 (!%p4171_p3), %v4417_v19  ;;  %v3698_v15 = vld [vmem:[#allocation7 + $0x348] sm:$0xff] (!%p4171_p3)  ;;  %v3700_v16 = vld [vmem:[#allocation7 + $0x358] sm:$0xff] (!%p4171_p3)  ;;  %v3633_v19 = vld [vmem:[#allocation7 + $0x140] sm:$0xff] (!%p4171_p3) }
 0x463   : > { %3549 = vst [vmem:[#allocation2] sm:$0xff] %v3548_v18  ;;  %v3680_v18 = vld [vmem:[#allocation7 + $0x2b8] sm:$0xff] (!%p4171_p3)  ;;  %v4439_v24 = vpack.c.bf16 (!%p4171_p3), %v3700_v16, %v3698_v15  ;;  %v3650_v13 = vld [vmem:[#allocation7 + $0x1c8] sm:$0xff] (!%p4171_p3) }
 0x464   : > { %v4419_v26 = vpack.c.bf16 %v3680_v18, %v3678_v17  ;;  %4356 = vmatprep.subr.bf16.mxu1 %v4355_v21  ;;  %v4373_v17 = vpack.c.bf16 %v3631_v9, %v3629_v8  ;;  %v4437_v18 = vpack.c.bf16 %v3695_v12, %v3693_v10  ;;  %v3635_v21 = vld [vmem:[#allocation7 + $0x150] sm:$0xff]  ;;  %v3709_v9 = vld [vmem:[#allocation7 + $0x3a0] sm:$0xff]  ;;  %v3652_v14 = vld [vmem:[#allocation7 + $0x1d8] sm:$0xff] }
 0x465   : > { %4358 = vmatpush1.bf16.msra.mxu1 %v4357_v33  ;;  %v4377_v31 = vpack.c.bf16 %v3635_v21, %v3633_v19  ;;  %v3637_v33 = vld [vmem:[#allocation7 + $0x160] sm:$0xff]  ;;  %v3647_v8 = vld [vmem:[#allocation7 + $0x1b0] sm:$0xff]  ;;  %v3714_v16 = vld [vmem:[#allocation7 + $0x3c8] sm:$0xff]  ;;  %v4391_v21 = vpack.c.bf16 %v3652_v14, %v3650_v13 }
 0x466   : > { %4420 = vmatprep.subr.bf16.mxu0 %v4419_v26  ;;  %4360 = vmatprep.subr.bf16.mxu1 %v4359_v35  ;;  %v3638_v26 = vld [vmem:[#allocation7 + $0x168] sm:$0xff]  ;;  %v3563_v35 = vsub.s32 1, %v4993_v32  ;;  %v3711_v12 = vld [vmem:[#allocation7 + $0x3b0] sm:$0xff]  ;;  %v3907_v13 = vld [vmem:[%s5507_s7 + $0x40] sm:$0xff] }
 0x467   : > { %4422 = vmatpush1.bf16.msra.mxu0 %v4421_v34  ;;  %v3639_v34 = vld [vmem:[#allocation7 + $0x170] sm:$0xff]  ;;  %v4453_v19 = vpack.c.bf16 %v3711_v12, %v3709_v9  ;;  %v3917_v56 = vld [vmem:[%s5507_s7 + $0x90] sm:$0xff]  ;;  %v3923_v9 = vld [vmem:[%s5507_s7 + $0xc0] sm:$0xff] }
 0x468   : > { %4424 = vmatprep.subr.bf16.mxu0 %v4423_v40  ;;  %v4379_v40 = vpack.c.bf16 %v3640_v27, %v3638_v26  ;;  %v3564_v51 = vrot.slane %v3555_v45, %v3563_v35  ;;  %v3715_v27 = vld [vmem:[#allocation7 + $0x3d0] sm:$0xff]  ;;  %v3908_v14 = vld [vmem:[%s5507_s7 + $0x48] sm:$0xff] }
 0x469   : > { %4362 = vmatpush1.bf16.msra.mxu1 %v4361_v20  ;;  %v4381_v20 = vpack.c.bf16 %v3639_v34, %v3637_v33  ;;  %v3718_v33 = vld [vmem:[#allocation7 + $0x3e8] sm:$0xff]  ;;  %v3720_v34 = vld [vmem:[#allocation7 + $0x3f8] sm:$0xff] }
 0x46a   : > { %4364 = vmatprep.subr.bf16.mxu1 %v4363_v50  ;;  %v3708_v50 = vld [vmem:[#allocation7 + $0x398] sm:$0xff]  ;;  %v3573_v63 = vcombine.low %v3560_v46, %v3564_v51  ;;  %v4459_v48 = vpack.c.bf16 %v3720_v34, %v3718_v33  ;;  %v3916_v46 = vld [vmem:[%s5507_s7 + $0x88] sm:$0xff]  ;;  %v3913_v34 = vld [vmem:[%s5507_s7 + $0x70] sm:$0xff] }
 0x46b   : > { %4426 = vmatpush1.bf16.msra.mxu0 %v4425_v49  ;;  %v3706_v49 = vld [vmem:[#allocation7 + $0x388] sm:$0xff]  ;;  %v3554_v10 = vld [vmem:[#allocation2] sm:$0xff] }
 0x46c   : > { %4428 = vmatprep.subr.bf16.mxu0 %v4427_v53  ;;  %v3568_v53 = vrot.slane %v3555_v45, %v3567_v36  ;;  %v3581_v4 = vrot.slane %v3573_v63, %v5001_v43  ;;  %v3915_v45 = vld [vmem:[%s5507_s7 + $0x80] sm:$0xff]  ;;  %v3920_v63 = vld [vmem:[%s5507_s7 + $0xa8] sm:$0xff] }
 0x46d   : > { %4366 = vmatpush1.bf16.msra.mxu1 %v4365_v58  ;;  %v3705_v58 = vld [vmem:[#allocation7 + $0x380] sm:$0xff] }
 0x46e   : > { %4368 = vmatprep.subr.bf16.mxu1 %v4367_v60  ;;  %v3707_v60 = vld [vmem:[#allocation7 + $0x390] sm:$0xff] }
 0x46f   : > { %4430 = vmatpush1.bf16.msra.mxu0 %v4429_v59  ;;  %v4447_v59 = vpack.c.bf16 %v3708_v50, %v3706_v49 }
 0x470   : > { %4432 = vmatprep.subr.bf16.mxu0 %v4431_v38  ;;  %v3574_v38 = vcombine.low %v3568_v53, %v3572_v52 }
 0x471   : > { %4370 = vmatpush1.bf16.msra.mxu1 %v4369_v5 }
 0x472   : > { %4372 = vmatprep.subr.bf16.mxu1 %v4371_v7  ;;  %v3588_v5 = vrot.slane %v3574_v38, %v5001_v43  ;;  %v4387_v7 = vpack.c.bf16 %v3648_v62, %v3646_v61  ;;  %v3902_v61 = vld [vmem:[%s5507_s7 + $0x18] sm:$0xff]  ;;  %v3919_v62 = vld [vmem:[%s5507_s7 + $0xa0] sm:$0xff] }
 0x473   : > { %4434 = vmatpush1.bf16.msra.mxu0 %v4433_v6  ;;  %v4449_v6 = vpack.c.bf16 %v3707_v60, %v3705_v58  ;;  %v3901_v60 = vld [vmem:[%s5507_s7 + $0x10] sm:$0xff] }
 0x474   : > { %4436 = vmatprep.subr.bf16.mxu0 %v4435_v11  ;;  %v4451_v11 = vpack.c.bf16 %v3712_v1, %v3710_v0  ;;  %v3589_v15 = vcombine.low %v3581_v4, %v3588_v5  ;;  %v4469_v38 = vpack.c.bf16 %v3902_v61, %v3901_v60  ;;  %v4471_v0 = vpack.c.bf16 %v3920_v63, %v3919_v62  ;;  %v3903_v1 = vld [vmem:[%s5507_s7 + $0x20] sm:$0xff]  ;;  %v3922_v4 = vld [vmem:[%s5507_s7 + $0xb8] sm:$0xff] }
 0x475   : > { %4374 = vmatpush1.bf16.msra.mxu1 %v4373_v17  ;;  %v3716_v17 = vld [vmem:[#allocation7 + $0x3d8] sm:$0xff] }
 0x476   : > { %4376 = vmatprep.subr.bf16.mxu1 %v4375_v47  ;;  %v3591_v47 = vadd.f32 %v3589_v15, %v3554_v10  ;;  %v4455_v26 = vpack.c.bf16 %v3716_v17, %v3714_v16  ;;  %v3924_v10 = vld [vmem:[%s5507_s7 + $0xc8] sm:$0xff]  ;;  %v3925_v15 = vld [vmem:[%s5507_s7 + $0xd0] sm:$0xff]  ;;  %v3926_v16 = vld [vmem:[%s5507_s7 + $0xd8] sm:$0xff]  ;;  %v4481_v17 = vpack.c.bf16 %v3908_v14, %v3907_v13 }
 0x477   : > { %4438 = vmatpush1.bf16.msra.mxu0 %v4437_v18  ;;  %v4389_v18 = vpack.c.bf16 %v3647_v8, %v3645_v3  ;;  %v3921_v3 = vld [vmem:[%s5507_s7 + $0xb0] sm:$0xff]  ;;  %v3906_v8 = vld [vmem:[%s5507_s7 + $0x38] sm:$0xff]  ;;  %v4479_v12 = vpack.c.bf16 %v3924_v10, %v3923_v9 }
 0x478   : > { %4440 = vmatprep.subr.bf16.mxu0 %v4439_v24  ;;  %v3651_v24 = vld [vmem:[#allocation7 + $0x1d0] sm:$0xff] }
 0x479   : > { %4378 = vmatpush1.bf16.msra.mxu1 %v4377_v31  ;;  %v3592_v31 = vmax.f32 %v3591_v47, 0.0  ;;  %v4393_v36 = vpack.c.bf16 %v3651_v24, %v3649_v23  ;;  %v3909_v47 = vld [vmem:[%s5507_s7 + $0x50] sm:$0xff]  ;;  %v3927_v23 = vld [vmem:[%s5507_s7 + $0xe0] sm:$0xff]  ;;  %v3928_v24 = vld [vmem:[%s5507_s7 + $0xe8] sm:$0xff] }
 0x47a   : > { %4380 = vmatprep.subr.bf16.mxu1 %v4379_v40  ;;  %v4457_v40 = vpack.c.bf16 %v3715_v27, %v3713_v25  ;;  %v4487_v25 = vpack.c.bf16 %v3928_v24, %v3927_v23  ;;  %v3912_v27 = vld [vmem:[%s5507_s7 + $0x68] sm:$0xff] }
 0x47b   : > { %4442 = vmatpush1.bf16.msra.mxu0 %v4441_v39  ;;  %v3741_v37 = vrot.slane %v3592_v31, %v5001_v43  ;;  %v3734_v39 = vcombine.high %v3592_v31, %v3592_v31  ;;  %v3930_v31 = vld [vmem:[%s5507_s7 + $0xf8] sm:$0xff] }
 0x47c   : > { %4444 = vmatprep.subr.bf16.mxu0 %v4443_v42  ;;  %v3653_v42 = vld [vmem:[#allocation7 + $0x1e0] sm:$0xff]  ;;  %v4491_v33 = vpack.c.bf16 %v3930_v31, %v3929_v22 }
 0x47d   : > { %4382 = vmatpush1.bf16.msra.mxu1 %v4381_v20  ;;  %v3719_v20 = vld [vmem:[#allocation7 + $0x3f0] sm:$0xff]  ;;  %v3749_v49 = vcombine.high %v3741_v37, %v3741_v37  ;;  %v3748_v50 = vrot.slane %v3734_v39, %v5001_v43  ;;  %v4397_v51 = vpack.c.bf16 %v3655_v44, %v3653_v42  ;;  %v3899_v43 = vld [vmem:[%s5507_s7] sm:$0xff] }
 0x47e   : > { %4384 = vmatprep.subr.bf16.mxu1 %v4383_v55  ;;  %v4461_v52 = vpack.c.bf16 %v3719_v20, %v3717_v30  ;;  %v3900_v55 = vld [vmem:[%s5507_s7 + $0x8] sm:$0xff]  ;;  %v3721_v39 = vld [vmem:[%s5506_s6] sm:$0x3] }
 0x47f   : > { %4446 = vmatpush1.bf16.msra.mxu0 %v4445_v54  ;;  %3819 = vmatprep.mubr.f32.mxu1 %v3749_v49  ;;  %v3750_v53 = vcombine.high %v3748_v50, %v3748_v50  ;;  %v4463_v54 = vpack.c.bf16 %v3916_v46, %v3915_v45  ;;  %v4465_v58 = vpack.c.bf16 %v3900_v55, %v3899_v43 }
 0x480   : > { %4448 = vmatprep.subr.bf16.mxu0 %v4447_v59  ;;  %v4467_v59 = vpack.c.bf16 %v3918_v57, %v3917_v56 }
 0x481   : > { %4386 = vmatpush1.bf16.msra.mxu1 %v4385_v2  ;;  %3890 = vmatprep.mubr.f32.mxu0 %v3750_v53  ;;  %v3904_v2 = vld [vmem:[%s5507_s7 + $0x28] sm:$0xff] }
 0x482   : > { %4388 = vmatprep.subr.bf16.mxu1 %v4387_v7  ;;  %v4473_v5 = vpack.c.bf16 %v3904_v2, %v3903_v1  ;;  %v3905_v7 = vld [vmem:[%s5507_s7 + $0x30] sm:$0xff] }
 0x483   : > { %4450 = vmatpush1.bf16.msra.mxu0 %v4449_v6  ;;  %v4475_v6 = vpack.c.bf16 %v3922_v4, %v3921_v3 }
 0x484   : > { %4452 = vmatprep.subr.bf16.mxu0 %v4451_v11  ;;  %v4477_v11 = vpack.c.bf16 %v3906_v8, %v3905_v7 }
 0x485   : > { %4390 = vmatpush1.bf16.msra.mxu1 %v4389_v18  ;;  %v4483_v18 = vpack.c.bf16 %v3926_v16, %v3925_v15 }
 0x486   : > { %4392 = vmatprep.subr.bf16.mxu1 %v4391_v21 }
 0x487   : > { %4454 = vmatpush1.bf16.msra.mxu0 %v4453_v19  ;;  %v3910_v19 = vld [vmem:[%s5507_s7 + $0x58] sm:$0xff] }
 0x488   : > { %4456 = vmatprep.subr.bf16.mxu0 %v4455_v26  ;;  %v4485_v21 = vpack.c.bf16 %v3910_v19, %v3909_v47  ;;  %v3911_v26 = vld [vmem:[%s5507_s7 + $0x60] sm:$0xff] }
 0x489   : > { %4394 = vmatpush1.bf16.msra.mxu1 %v4393_v36  ;;  %v4489_v28 = vpack.c.bf16 %v3912_v27, %v3911_v26  ;;  %v3914_v36 = vld [vmem:[%s5507_s7 + $0x78] sm:$0xff] }
 0x48a   : > { %4396 = vmatprep.subr.bf16.mxu1 %v4395_v41  ;;  %v3730_v41 = vrot.slane %v3721_v39, %v3563_v35 }
 0x48b   : > { %4458 = vmatpush1.bf16.msra.mxu0 %v4457_v40  ;;  %v3726_v40 = vrot.slane %v3721_v39, %v3559_v29 }
 0x48c   : > { %4460 = vmatprep.subr.bf16.mxu0 %v4459_v48 }
 0x48d   : > { %4398 = vmatpush1.bf16.msra.mxu1 %v4397_v51 }
 0x48e   : > { %4464 = vmatprep.subr.bf16.mxu1 %v4463_v54 }
 0x48f   : > { %4462 = vmatpush1.bf16.msra.mxu0 %v4461_v52 }
 0x490   : > { %3820 = vmatmul.mubr.f32.vlgmr.msra.gmra.mrb[0].mxu1 %v3741_v37  ;;  %v4493_v37 = vpack.c.bf16 %v3914_v36, %v3913_v34 }
 0x491   : > { %4466 = vmatpush3.bf16.msra.mxu1 %v4465_v58 }
 0x492   : > { %3891 = vmatmul.mubr.f32.vlgmr.msra.gmra.mrb[0].mxu0 %v3748_v50  ;;  %4468 = vmatprep.subr.bf16.mxu1 %v4467_v59 }
 0x495   : > { %4470 = vmatpush3.bf16.msra.mxu1 %v4469_v38 }
 0x496   : > { %4472 = vmatprep.subr.bf16.mxu1 %v4471_v0 }
 0x499   : > { %4474 = vmatpush3.bf16.msra.mxu1 %v4473_v5 }
 0x49a   : > { %4476 = vmatprep.subr.bf16.mxu1 %v4475_v6 }
 0x49d   : > { %4478 = vmatpush3.bf16.msra.mxu1 %v4477_v11 }
 0x49e   : > { %4480 = vmatprep.subr.bf16.mxu1 %v4479_v12 }
 0x4a1   : > { %4482 = vmatpush3.bf16.msra.mxu1 %v4481_v17 }
 0x4a2   : > { %4484 = vmatprep.subr.bf16.mxu1 %v4483_v18 }
 0x4a5   : > { %4486 = vmatpush3.bf16.msra.mxu1 %v4485_v21 }
 0x4a6   : > { %4488 = vmatprep.subr.bf16.mxu1 %v4487_v25 }
 0x4a9   : > { %4490 = vmatpush3.bf16.msra.mxu1 %v4489_v28 }
 0x4aa   : > { %4492 = vmatprep.subr.bf16.mxu1 %v4491_v33 }
 0x4ad   : > { %4494 = vmatpush3.bf16.msra.mxu1 %v4493_v37 }
 0x563   : > { %v3821_v42 = vpop.f32.mrb[0].mxu1 }
 0x564   : > { %v3822_v44 = vadd.f32 %v3821_v42, %v3726_v40  ;;  %v3823_v30 = vpop.f32.mrb[1].mxu1 }
 0x565   : > { %v3892_v48 = vpop.f32.mrb[0].mxu0  ;;  %v3824_v20 = vadd.f32 %v3823_v30, %v3730_v41 }
 0x566   : > { %v3894_v49 = vpop.f32.mrb[1].mxu0  ;;  %v3893_v50 = vadd.f32 %v3892_v48, %v3822_v44 }
 0x567   : > { %v3895_v45 = vadd.f32 %v3894_v49, %v3824_v20 }
 0x568   : > { %v3897_v51 = vmax.f32 %v3893_v50, 0.0 }
 0x569   : > { %v3898_v46 = vmax.f32 %v3895_v45, 0.0 }
 0x56b   : > { %3995 = vmatprep.mubr.f32.mxu1 %v3898_v46 }
 0x56c   : > { %3996 = vmatmul.mubr.f32.vlgmr.msra.gmra.mrb[2].mxu1 %v3897_v51 }
 0x63f   : > { %v4228_v53 = vpop.f32.mrb[2].mxu1 }
 0x640   : > { %v4229_v52 = vpop.f32.mrb[3].mxu1 }
 0x641   : > { %v4230_v54 = vadd.f32 %v4229_v52, %v4228_v53 }
 0x643   : > { %v4001_v43 = vmax.f32 %v4230_v54, 0.0 }
 0x645   : > { %v4002_v29 = vmin.f32 %v4001_v43, 6.0 }
 0x647   : > { %4004 = vst.msk [vmem:[#allocation9] sm:$0x3] %vm4003_vm10, %v4002_v29 }
 0x648 PF: > { %p4551_p6 = scmp.eq.s32.totalorder %s4836_s9, 2  ;;  %s4771_s23 = smov [#allocation9]  }
 0x649   : > { %s4012_s25 = sshll.u32 %s4771_s23, 4  ;;  %s4013_s25 = int_to_ptr.vmem [resolvable:$true] %s4012_s25 }
 0x64a   : > { %s4687_s14 = scalar_lea.vmem %s4013_s25, 32  ;;  %p4694_p4 = scmp.lt.s32.totalorder %s4013_s25, %s4013_s25 }
 0x64b   : > { %p4688_p7 = scmp.ne.s32.totalorder %s4013_s25, %s4687_s14  ;;  %p4695_p8 = scmp.lt.s32.totalorder %s4687_s14, %s4687_s14 }
 0x64d   : > { %p4689_p11 = pnand %p4688_p7, %p4551_p6  ;;  %p4696_p10 = por %p4695_p8, %p4694_p4 }
 0x64f   : > { %p4690_p13 = pneg %p4689_p11 }
 0x651   : > { %p4697_p5 = pnand %p4696_p10, %p4690_p13 }
 0x653   : > { %4700 = shalt.err (!%p4697_p5)
}
 0x654   : > { %s4701_s19 = scalar_lea.hbm %s5508_s8, 32 }
 0x655   : > { %p4702_p9 = scmp.ne.s32.totalorder %s5508_s8, %s4701_s19  ;;  %p4707_p1 = scmp.lt.u32.totalorder %s4701_s19, %s5508_s8 }
 0x657   : > { %p4703_p12 = pnand %p4702_p9, %p4551_p6 }
 0x659   : > { %p4704_p0 = pneg %p4703_p12 }
 0x65b   : > { %p4709_p2 = pnand %p4707_p1, %p4704_p0 }
 0x65d   : > { %4712 = shalt.err (!%p4709_p2)
}
 0x65e   : > { %4542 = dma.vmem_to_hbm [thread:$0]  (%p4551_p6), %s4013_s25, 32, %s5508_s8, [#allocation5]  }
 0x65f   : > { %4738 = dma.done.wait (%p4551_p6), [#allocation5], 32  }
 0x660   : > { %4740 = vsyncadd (%p4551_p6), [#allocation5], 4294967264 }
 0x661 PF: > { %p20_p3 = scmp.ge.s32.totalorder %s4839_s10, 5   ;;  %s5523_s27 = smov %s4747_s28 }
 0x662   : > { %s5524_s28 = smov %s4751_s29  ;;  %s5525_s29 = smov %s4849_s13 }
 0x663   : > { %s5526_s30 = smov %s4839_s10  ;;  %22 = sbr.rel (!%p20_p3) target bundleno = 5 (0x5), region = 141 }
 0x66a   :  { %4025 = vsyncpa [#allocation4], 1 }
 0x66b   :  { %4027 = vsyncpa [#allocation4 + $0x1], 1 }
 0x66c   :  { %4028 = vsyncpa [#allocation8], 1 }
 0x66d   :  { %4029 = vsyncpa [#allocation5], 1 }
 0x66e   :  { %4031 = vsyncpa [#allocation5 + $0x1], 1 }

</bundles_post_ra>
